<compile_context>
chip_gen: v6e
topology: v6e:2x2x1
jax: 0.10.0
libtpu: 0.0.40
codegen_flags: <defaults>
</compile_context>

<pallas_src>
import functools

import jax
import jax.numpy as jnp
from jax.experimental import pallas as pl
from jax.experimental.pallas import tpu as pltpu

LANES = 128                      # padded channel / lane width everywhere
_BN_EPS = 1e-5
_VMEM_LIMIT = 32 * 1024 * 1024   # v7x scoped default; ample for these tiles
_VMEM = pl.BlockSpec(memory_space=pltpu.MemorySpace.VMEM)


def _round_up(x, m):
    return (x + m - 1) // m * m


def _pad_axis(a, axis, target):
    pad = target - a.shape[axis]
    if pad == 0:
        return a
    widths = [(0, 0)] * a.ndim
    widths[axis] = (0, pad)
    return jnp.pad(a, widths)


def _pick_tm(m, target=1024):
    # Big tiles amortize the ~0.35us/step overhead; keep >= 2 tiles on the
    # parallel M axis so both v7x TensorCores get work.
    tm = min(target, _round_up(m, 8))
    if tm >= m and m > 8:
        tm = _round_up(pl.cdiv(m, 2), 8)
    return max(tm, 8)


# ----------------------------- Pallas kernels -----------------------------

def _conv1_kernel(p_ref, w_ref, b_ref, o_ref):
    # Stem conv as a lane-dense GEMM: (tm, K) x (K, 128), K = 9*Cin (tiny).
    acc = jnp.dot(p_ref[...], w_ref[...], preferred_element_type=jnp.float32)
    o_ref[...] = jnp.maximum(acc + b_ref[...], 0.0).astype(o_ref.dtype)


def _maxpool_kernel(a_ref, b_ref, c_ref, o_ref):
    # 3x3 stride-2 pad-1 max pool. The 3 refs are the (clamped) input rows of
    # this output row in a column-paired layout (even|odd cols in lanes).
    # Values are post-ReLU (>= 0) so clamped / zero padding == -inf padding.
    cch = o_ref.shape[-1]

    def row_hmax(ref):
        row = ref[0, 0].astype(jnp.float32)              # (Wo, 2C)
        even, odd = row[:, :cch], row[:, cch:]
        odd_prev = jnp.concatenate(
            [jnp.zeros((1, cch), jnp.float32), odd[:-1]], axis=0)
        return jnp.maximum(jnp.maximum(even, odd), odd_prev)

    m = jnp.maximum(jnp.maximum(row_hmax(a_ref), row_hmax(b_ref)),
                    row_hmax(c_ref))
    o_ref[0, 0] = m.astype(o_ref.dtype)


def _res_conv1_kernel(y_ref, w_ref, s_ref, b_ref, o_ref, acc_ref):
    # 3x3 stride-2 conv + BN + ReLU; grid = (N, out_row, ky).
    # y_ref: one column-paired input row (1,1,Wo,2C); w_ref: (3, 3C, 128) resident.
    ho = pl.program_id(1)
    ky = pl.program_id(2)

    @pl.when(ky == 0)
    def _():
        acc_ref[...] = jnp.zeros_like(acc_ref)

    valid = jnp.logical_not(jnp.logical_and(ho == 0, ky == 0))   # row -1 = zero pad

    @pl.when(valid)
    def _():
        row = y_ref[0, 0].astype(jnp.float32)            # (Wo, 2C)
        even, odd = row[:, :LANES], row[:, LANES:]
        odd_prev = jnp.concatenate(
            [jnp.zeros((1, LANES), jnp.float32), odd[:-1]], axis=0)
        # taps kx = 0,1,2  <->  input cols 2wo-1, 2wo, 2wo+1
        patch = jnp.concatenate([odd_prev, even, odd], axis=-1).astype(jnp.bfloat16)
        acc_ref[...] += jnp.dot(patch, w_ref[ky],
                                preferred_element_type=jnp.float32)

    @pl.when(ky == pl.num_programs(2) - 1)
    def _():
        out = jnp.maximum(acc_ref[...] * s_ref[...] + b_ref[...], 0.0)
        o_ref[0, 0] = out.astype(o_ref.dtype)


def _res_conv2_kernel(o1_ref, ysc_ref, w_ref, wsc_ref, s_ref, b_ref,
                      pooled_ref, acc_ref):
    # 3x3 stride-1 conv + BN2 + fused 1x1 stride-2 shortcut + residual add +
    # ReLU + global-average-pool partial sums. grid = (N, out_row, ky).
    ho = pl.program_id(1)
    ky = pl.program_id(2)
    n_rows = pl.num_programs(1)

    @pl.when(jnp.logical_and(ho == 0, ky == 0))
    def _():
        pooled_ref[...] = jnp.zeros_like(pooled_ref)

    @pl.when(ky == 0)
    def _():
        # 1x1 stride-2 shortcut: even columns of block-input row 2*ho. Its
        # weights are pre-divided by the BN2 scale so the shared epilogue
        # `acc * s2 + (b2 + b_sc)` reproduces BN2(conv2(o1)) + conv1x1(y).
        sc = ysc_ref[0, 0][:, :LANES]                    # (Wo, 128) bf16
        acc_ref[...] = jnp.dot(sc, wsc_ref[...],
                               preferred_element_type=jnp.float32)

    r = ho + ky - 1
    valid = jnp.logical_and(r >= 0, r <= n_rows - 1)

    @pl.when(valid)
    def _():
        row = o1_ref[0, 0].astype(jnp.float32)           # (Wo, 128)
        zero = jnp.zeros((1, LANES), jnp.float32)
        prev = jnp.concatenate([zero, row[:-1]], axis=0)
        nxt = jnp.concatenate([row[1:], zero], axis=0)
        # taps kx = 0,1,2  <->  input cols wo-1, wo, wo+1
        patch = jnp.concatenate([prev, row, nxt], axis=-1).astype(jnp.bfloat16)
        acc_ref[...] += jnp.dot(patch, w_ref[ky],
                                preferred_element_type=jnp.float32)

    @pl.when(ky == pl.num_programs(2) - 1)
    def _():
        out = jnp.maximum(acc_ref[...] * s_ref[...] + b_ref[...], 0.0)
        pooled_ref[...] += jnp.sum(out, axis=0, keepdims=True)[None]


def _fc_kernel(x_ref, w_ref, b_ref, o_ref):
    # Tiny (N,128)x(128,128) f32 matmul; 1/(H*W) is folded into w_ref.
    o_ref[...] = (jnp.dot(x_ref[...], w_ref[...],
                          preferred_element_type=jnp.float32) + b_ref[...])


# ----------------------------- Kernel wrappers -----------------------------

def _conv1_bn_relu(x_nhwc, w_km, bias):
    # 3x3 stride-1 pad-1 stem conv + folded BN + ReLU; cout lane-padded to 128.
    n, h, w, cin = x_nhwc.shape
    kp = w_km.shape[0]
    xp = jnp.pad(x_nhwc, ((0, 0), (1, 1), (1, 1), (0, 0)))
    m = n * h * w
    cols = [xp[:, ky:ky + h, kx:kx + w, :].reshape(m, cin)
            for ky in range(3) for kx in range(3)]
    patches = _pad_axis(jnp.concatenate(cols, axis=-1), 1, kp).astype(jnp.bfloat16)
    tm = _pick_tm(m)
    mp = _round_up(m, tm)
    patches = _pad_axis(patches, 0, mp)

    out = pl.pallas_call(
        _conv1_kernel,
        out_shape=jax.ShapeDtypeStruct((mp, LANES), jnp.bfloat16),
        grid_spec=pltpu.PrefetchScalarGridSpec(
            num_scalar_prefetch=0, grid=(mp // tm,),
            in_specs=[pl.BlockSpec((tm, kp), lambda i: (i, 0)),
                      pl.BlockSpec((kp, LANES), lambda i: (0, 0)),
                      pl.BlockSpec((1, LANES), lambda i: (0, 0))],
            out_specs=pl.BlockSpec((tm, LANES), lambda i: (i, 0))),
        compiler_params=pltpu.CompilerParams(
            dimension_semantics=("parallel",), vmem_limit_bytes=_VMEM_LIMIT),
        cost_estimate=pl.CostEstimate(
            flops=2 * mp * kp * LANES, transcendentals=0,
            bytes_accessed=2 * (mp * kp + kp * LANES + mp * LANES)),
    )(patches, w_km, bias)
    return out[:m].reshape(n, h, w, LANES)


def _maxpool_3x3_s2_p1(y_nhwc):
    n, h, w, c = y_nhwc.shape
    assert h % 2 == 0 and w % 2 == 0
    ho, wo = h // 2, w // 2
    yp = y_nhwc.reshape(n, h, wo, 2 * c)          # column-paired view (free)

    in_specs = [
        pl.BlockSpec((1, 1, wo, 2 * c),
                     lambda i, j: (i, jnp.maximum(2 * j - 1, 0), 0, 0)),
        pl.BlockSpec((1, 1, wo, 2 * c), lambda i, j: (i, 2 * j, 0, 0)),
        pl.BlockSpec((1, 1, wo, 2 * c), lambda i, j: (i, 2 * j + 1, 0, 0)),
    ]
    return pl.pallas_call(
        _maxpool_kernel,
        out_shape=jax.ShapeDtypeStruct((n, ho, wo, c), y_nhwc.dtype),
        grid_spec=pltpu.PrefetchScalarGridSpec(
            num_scalar_prefetch=0, grid=(n, ho),
            in_specs=in_specs,
            out_specs=pl.BlockSpec((1, 1, wo, c), lambda i, j: (i, j, 0, 0))),
        compiler_params=pltpu.CompilerParams(
            dimension_semantics=("parallel", "parallel"),
            vmem_limit_bytes=_VMEM_LIMIT),
        cost_estimate=pl.CostEstimate(
            flops=9 * n * ho * wo * c, transcendentals=0,
            bytes_accessed=2 * (3 * n * ho * wo * 2 * c + n * ho * wo * c)),
    )(yp, yp, yp)


def _res_conv1(yp, w_taps, scale, bias):
    # yp: column-paired (N, H', W'/2, 2*128); 3x3 stride-2 conv + BN + ReLU.
    n, hy, wg, c2 = yp.shape
    assert hy % 2 == 0 and c2 == 2 * LANES
    ho, wo = hy // 2, wg

    return pl.pallas_call(
        _res_conv1_kernel,
        out_shape=jax.ShapeDtypeStruct((n, ho, wo, LANES), jnp.bfloat16),
        grid_spec=pltpu.PrefetchScalarGridSpec(
            num_scalar_prefetch=0, grid=(n, ho, 3),
            in_specs=[
                pl.BlockSpec((1, 1, wg, c2),
                             lambda i, j, k: (i, jnp.maximum(2 * j + k - 1, 0), 0, 0)),
                pl.BlockSpec((3, 3 * LANES, LANES), lambda i, j, k: (0, 0, 0)),
                pl.BlockSpec((1, LANES), lambda i, j, k: (0, 0)),
                pl.BlockSpec((1, LANES), lambda i, j, k: (0, 0)),
            ],
            out_specs=pl.BlockSpec((1, 1, wo, LANES),
                                   lambda i, j, k: (i, j, 0, 0)),
            scratch_shapes=[pltpu.VMEM((wo, LANES), jnp.float32)]),
        compiler_params=pltpu.CompilerParams(
            dimension_semantics=("parallel", "arbitrary", "arbitrary"),
            vmem_limit_bytes=_VMEM_LIMIT),
        cost_estimate=pl.CostEstimate(
            flops=2 * n * ho * wo * 9 * LANES * LANES, transcendentals=0,
            bytes_accessed=2 * (n * hy * wg * c2 + 9 * LANES * LANES
                                + n * ho * wo * LANES)),
    )(yp, w_taps, scale, bias)


def _res_conv2_pool(o1, yp, w_taps, w_sc, scale, bias_total):
    # conv2 + BN2 + fused 1x1 stride-2 shortcut + residual add + ReLU + global
    # average-pool partial sums. Only the (N, 128) pooled sums go back to HBM.
    n, ho, wo, c = o1.shape
    assert c == LANES

    def o1_map(i, j, k):
        return (i, jnp.minimum(jnp.maximum(j + k - 1, 0), ho - 1), 0, 0)

    pooled = pl.pallas_call(
        _res_conv2_kernel,
        out_shape=jax.ShapeDtypeStruct((n, 1, LANES), jnp.float32),
        grid_spec=pltpu.PrefetchScalarGridSpec(
            num_scalar_prefetch=0, grid=(n, ho, 3),
            in_specs=[
                pl.BlockSpec((1, 1, wo, LANES), o1_map),
                pl.BlockSpec((1, 1, wo, 2 * LANES),
                             lambda i, j, k: (i, 2 * j, 0, 0)),
                pl.BlockSpec((3, 3 * LANES, LANES), lambda i, j, k: (0, 0, 0)),
                pl.BlockSpec((LANES, LANES), lambda i, j, k: (0, 0)),
                pl.BlockSpec((1, LANES), lambda i, j, k: (0, 0)),
                pl.BlockSpec((1, LANES), lambda i, j, k: (0, 0)),
            ],
            out_specs=pl.BlockSpec((1, 1, LANES), lambda i, j, k: (i, 0, 0)),
            scratch_shapes=[pltpu.VMEM((wo, LANES), jnp.float32)]),
        compiler_params=pltpu.CompilerParams(
            dimension_semantics=("parallel", "arbitrary", "arbitrary"),
            vmem_limit_bytes=_VMEM_LIMIT),
        cost_estimate=pl.CostEstimate(
            flops=2 * n * ho * wo * 10 * LANES * LANES, transcendentals=0,
            bytes_accessed=2 * (n * ho * wo * 3 * LANES + 10 * LANES * LANES)
                           + 4 * n * LANES),
    )(o1, yp, w_taps, w_sc, scale, bias_total)
    return pooled.reshape(n, LANES)


def _avgpool_fc(pooled, w_fc, b_fc, inv_hw):
    n = pooled.shape[0]
    w = w_fc * inv_hw                          # fold 1/(H*W); fc stays f32
    return pl.pallas_call(
        _fc_kernel,
        out_shape=jax.ShapeDtypeStruct((n, LANES), jnp.float32),
        in_specs=[_VMEM, _VMEM, _VMEM],
        out_specs=_VMEM,
        compiler_params=pltpu.CompilerParams(vmem_limit_bytes=_VMEM_LIMIT),
    )(pooled, w, b_fc)


# ----------------------------- Model forward --------------------------------

def resnet_forward(x_nchw, p, *, num_classes=10):
    x = jnp.transpose(x_nchw, (0, 2, 3, 1)).astype(jnp.float32)   # NCHW -> NHWC
    n, h, w = x.shape[0], x.shape[1], x.shape[2]
    assert h % 4 == 0 and w % 4 == 0

    # conv1: Conv(in, 64, 3, s1, p1) + BN + ReLU (channels padded 64 -> 128).
    y = _conv1_bn_relu(x, p['c1_w'], p['c1_b'])                   # (N,H,W,128)

    # conv2: MaxPool2d(kernel_size=3, stride=2, padding=1).
    y = _maxpool_3x3_s2_p1(y)                                     # (N,H/2,W/2,128)
    yp = y.reshape(n, h // 2, w // 4, 2 * LANES)                  # column-paired view

    # conv3: Residual(64 -> 128, stride=2) with fused shortcut + avg-pool sums.
    o1 = _res_conv1(yp, p['r1_w'], p['r1_s'], p['r1_b'])          # (N,H/4,W/4,128)
    pooled = _res_conv2_pool(o1, yp, p['r2_w'], p['rs_w'],
                             p['r2_s'], p['r2_bt'])               # (N,128) f32 sums

    # AdaptiveAvgPool2d(1) + flatten + Linear (pool summed in conv2 epilogue).
    inv_hw = 1.0 / float((h // 4) * (w // 4))
    logits = _avgpool_fc(pooled, p['fc_w'], p['fc_b'], inv_hw)
    return logits[:, :num_classes]


# ----------------------------- Parameters -----------------------------------

def init_torch_params(key, in_channels=1, num_classes=10):
    # Mirrors the PyTorch module's tensors (conv weight/bias, BN stats, fc).
    ks = iter(jax.random.split(key, 24))

    def nrm(shape, scale=0.05):
        return scale * jax.random.normal(next(ks), shape, jnp.float32)

    def conv(cout, cin, k):
        return {'w': nrm((cout, cin, k, k)), 'b': nrm((cout,))}

    def bn(c):
        # Eval-mode BN with fresh running stats; trained stats slot in here.
        return {'gamma': 1.0 + nrm((c,)), 'beta': nrm((c,)),
                'mean': jnp.zeros((c,), jnp.float32),
                'var': jnp.ones((c,), jnp.float32)}

    return {
        'conv1': conv(64, in_channels, 3), 'bn1': bn(64),
        'res_conv1': conv(128, 64, 3), 'res_bn1': bn(128),
        'res_conv2': conv(128, 128, 3), 'res_bn2': bn(128),
        'res_conv1x1': conv(128, 64, 1),   # bias=True, no BN (matches module)
        'fc': {'w': nrm((num_classes, 128)), 'b': nrm((num_classes,))},
    }


def fold_params(tp):
    # Fold eval-mode BN into scale/bias, lay out ky-major / kx-stacked weights,
    # zero-pad channels/classes to 128 lanes, cast MXU weights to bf16.
    def bn_scale_bias(bnp, conv_b):
        s = bnp['gamma'] / jnp.sqrt(bnp['var'] + _BN_EPS)
        b = (conv_b - bnp['mean']) * s + bnp['beta']
        return s, b

    def pad_lane(v):                                    # (c,) -> (1, 128) f32
        return _pad_axis(v.reshape(1, -1).astype(jnp.float32), 1, LANES)

    def conv3x3_taps(w):   # torch (Cout,Cin,3,3) -> (3 [ky], 3*128 [kx,cin], 128)
        wt = jnp.transpose(w, (2, 3, 1, 0))             # (ky, kx, cin, cout)
        wt = _pad_axis(_pad_axis(wt, 2, LANES), 3, LANES)
        return wt.reshape(3, 3 * LANES, LANES).astype(jnp.bfloat16)

    p = {}

    # Stem conv1 + BN1 (scale folded into the GEMM weights).
    w1, b1 = tp['conv1']['w'], tp['conv1']['b']
    s1, bb1 = bn_scale_bias(tp['bn1'], b1)
    cout1, cin = w1.shape[0], w1.shape[1]
    w1_t = jnp.transpose(w1, (2, 3, 1, 0)).reshape(9 * cin, cout1) * s1[None, :]
    kp = _round_up(9 * cin, 8)
    p['c1_w'] = _pad_axis(_pad_axis(w1_t, 0, kp), 1, LANES).astype(jnp.bfloat16)
    p['c1_b'] = pad_lane(bb1)

    # Residual conv1 (3x3, stride 2) + BN1 as epilogue scale/bias.
    sr1, br1 = bn_scale_bias(tp['res_bn1'], tp['res_conv1']['b'])
    p['r1_w'] = conv3x3_taps(tp['res_conv1']['w'])
    p['r1_s'], p['r1_b'] = pad_lane(sr1), pad_lane(br1)

    # Residual conv2 (3x3) + BN2, with the 1x1 stride-2 shortcut fused in:
    # shortcut weights pre-divided by the BN2 scale so the shared epilogue
    # `acc * s2 + (b2 + b_sc)` reproduces BN2(conv2(o1)) + conv1x1(y) exactly.
    sr2, br2 = bn_scale_bias(tp['res_bn2'], tp['res_conv2']['b'])
    p['r2_w'] = conv3x3_taps(tp['res_conv2']['w'])
    p['r2_s'] = pad_lane(sr2)
    wsc = jnp.transpose(tp['res_conv1x1']['w'][:, :, 0, 0])        # (Cin, Cout)
    wsc = _pad_axis(_pad_axis(wsc, 0, LANES), 1, LANES)
    s_row = pad_lane(sr2)
    safe = jnp.where(s_row != 0.0, s_row, 1.0)
    p['rs_w'] = jnp.where(s_row != 0.0, wsc / safe, 0.0).astype(jnp.bfloat16)
    p['r2_bt'] = pad_lane(br2) + pad_lane(tp['res_conv1x1']['b'])

    # fc: torch (out, in) -> (128, out padded to 128), kept f32.
    p['fc_w'] = _pad_axis(jnp.transpose(tp['fc']['w']).astype(jnp.float32), 1, LANES)
    p['fc_b'] = pad_lane(tp['fc']['b'])
    return p


# ----------------------------- Pure-JAX reference ---------------------------

def _reference_forward(x_nchw, tp, num_classes):
    f32 = jnp.float32
    x = x_nchw.astype(f32)

    def conv(z, w, b, stride, pad):
        out = jax.lax.conv_general_dilated(
            z, w.astype(f32), (stride, stride), [(pad, pad), (pad, pad)],
            dimension_numbers=('NCHW', 'OIHW', 'NCHW'))
        return out + b.astype(f32)[None, :, None, None]

    def bn(z, bp):
        s = bp['gamma'] / jnp.sqrt(bp['var'] + _BN_EPS)
        return ((z - bp['mean'][None, :, None, None]) * s[None, :, None, None]
                + bp['beta'][None, :, None, None])

    y = jax.nn.relu(bn(conv(x, tp['conv1']['w'], tp['conv1']['b'], 1, 1), tp['bn1']))
    y = jax.lax.reduce_window(y, -jnp.inf, jax.lax.max, (1, 1, 3, 3), (1, 1, 2, 2),
                              [(0, 0), (0, 0), (1, 1), (1, 1)])
    o1 = jax.nn.relu(bn(conv(y, tp['res_conv1']['w'], tp['res_conv1']['b'], 2, 1),
                        tp['res_bn1']))
    o2 = bn(conv(o1, tp['res_conv2']['w'], tp['res_conv2']['b'], 1, 1), tp['res_bn2'])
    sc = conv(y, tp['res_conv1x1']['w'], tp['res_conv1x1']['b'], 2, 0)
    z = jax.nn.relu(o2 + sc)
    pooled = jnp.mean(z, axis=(2, 3))
    return pooled @ jnp.transpose(tp['fc']['w']) + tp['fc']['b']


if __name__ == "__main__":
    key = jax.random.PRNGKey(0)
    kx, kparam = jax.random.split(key)
    x = jax.random.normal(kx, (2, 1, 16, 16), jnp.float32)   # NCHW, like PyTorch
    torch_params = init_torch_params(kparam, in_channels=1, num_classes=10)
    params = fold_params(torch_params)

    fwd = jax.jit(functools.partial(resnet_forward, num_classes=10))
    logits = fwd(x, params)
    jax.block_until_ready(logits)

    assert logits.shape == (2, 10), logits.shape
    assert bool(jnp.all(jnp.isfinite(logits)))

    ref = _reference_forward(x, torch_params, 10)
    max_err = float(jnp.max(jnp.abs(logits - ref)))
    assert max_err < 5e-2, f"max |kernel - reference| = {max_err}"
    print("KERNEL_OK")
</pallas_src>

<mosaic_0001>
module attributes {stable_mosaic.version = 11 : i64} {
  func.func @_conv1_kernel(%arg0: i32, %arg1: memref<256x16xbf16, #tpu.memory_space<vmem>>, %arg2: memref<16x128xbf16, #tpu.memory_space<vmem>>, %arg3: memref<1x128xf32, #tpu.memory_space<vmem>>, %arg4: memref<256x128xbf16, #tpu.memory_space<vmem>>) attributes {dimension_semantics = [#tpu.dimension_semantics<parallel>], iteration_bounds = array<i64: 2>, scalar_prefetch = 0 : i64, scratch_operands = 0 : i64, tpu.core_type = #tpu.core_type<tc>, window_params = [{transform_indices = @transform_0, window_bounds = array<i64: 256, 16>}, {pipeline_mode = #tpu.pipeline_mode<synchronous>, transform_indices = @transform_1, window_bounds = array<i64: 16, 128>}, {pipeline_mode = #tpu.pipeline_mode<synchronous>, transform_indices = @transform_2, window_bounds = array<i64: 1, 128>}, {transform_indices = @transform_3, window_bounds = array<i64: 256, 128>}]} {
    %c0 = arith.constant 0 : index
    %c0_0 = arith.constant 0 : index
    %0 = vector.load %arg1[%c0, %c0_0] : memref<256x16xbf16, #tpu.memory_space<vmem>>, vector<256x16xbf16>
    %c0_1 = arith.constant 0 : index
    %c0_2 = arith.constant 0 : index
    %1 = vector.load %arg2[%c0_1, %c0_2] : memref<16x128xbf16, #tpu.memory_space<vmem>>, vector<16x128xbf16>
    %cst = arith.constant dense<0.000000e+00> : vector<256x128xf32>
    %2 = tpu.matmul %0, %1, %cst {dimension_numbers = #tpu.dot_dimension_numbers<[1], [0], [0], [1], [0, 0, 1, 1], [], []>} : vector<256x16xbf16>, vector<16x128xbf16>, vector<256x128xf32> -> vector<256x128xf32>
    %c0_3 = arith.constant 0 : index
    %c0_4 = arith.constant 0 : index
    %3 = vector.load %arg3[%c0_3, %c0_4] : memref<1x128xf32, #tpu.memory_space<vmem>>, vector<1x128xf32>
    %4 = vector.broadcast %3 : vector<1x128xf32> to vector<256x128xf32>
    %5 = arith.addf %2, %4 : vector<256x128xf32>
    %cst_5 = arith.constant 0.000000e+00 : f32
    %6 = vector.broadcast %cst_5 : f32 to vector<256x128xf32>
    %7 = arith.maximumf %5, %6 : vector<256x128xf32>
    %8 = arith.truncf %7 : vector<256x128xf32> to vector<256x128xbf16>
    %c0_6 = arith.constant 0 : index
    %c0_7 = arith.constant 0 : index
    %9 = vector.load %arg4[%c0_6, %c0_7] : memref<256x128xbf16, #tpu.memory_space<vmem>>, vector<256x128xbf16>
    tpu.vector_store %arg4[%c0_6, %c0_7], %8 {strides = array<i32>} : memref<256x128xbf16, #tpu.memory_space<vmem>>, vector<256x128xbf16>,
    return
  }
  func.func @transform_0(%arg0: i32) -> (i32, i32) {
    %c0_i32 = arith.constant 0 : i32
    %c0_i32_0 = arith.constant 0 : i32
    return %arg0, %c0_i32 : i32, i32
  }
  func.func @transform_1(%arg0: i32) -> (i32, i32) {
    %c0_i32 = arith.constant 0 : i32
    %c0_i32_0 = arith.constant 0 : i32
    %c0_i32_1 = arith.constant 0 : i32
    return %c0_i32, %c0_i32_0 : i32, i32
  }
  func.func @transform_2(%arg0: i32) -> (i32, i32) {
    %c0_i32 = arith.constant 0 : i32
    %c0_i32_0 = arith.constant 0 : i32
    %c0_i32_1 = arith.constant 0 : i32
    return %c0_i32, %c0_i32_0 : i32, i32
  }
  func.func @transform_3(%arg0: i32) -> (i32, i32) {
    %c0_i32 = arith.constant 0 : i32
    %c0_i32_0 = arith.constant 0 : i32
    return %arg0, %c0_i32 : i32, i32
  }
}

module attributes {stable_mosaic.version = 11 : i64} {
  func.func @_maxpool_kernel(%arg0: i32, %arg1: i32, %arg2: memref<1x1x8x256xbf16, #tpu.memory_space<vmem>>, %arg3: memref<1x1x8x256xbf16, #tpu.memory_space<vmem>>, %arg4: memref<1x1x8x256xbf16, #tpu.memory_space<vmem>>, %arg5: memref<1x1x8x128xbf16, #tpu.memory_space<vmem>>) attributes {dimension_semantics = [#tpu.dimension_semantics<parallel>, #tpu.dimension_semantics<parallel>], iteration_bounds = array<i64: 2, 8>, scalar_prefetch = 0 : i64, scratch_operands = 0 : i64, tpu.core_type = #tpu.core_type<tc>, window_params = [{transform_indices = @transform_0, window_bounds = array<i64: 1, 1, 8, 256>}, {transform_indices = @transform_1, window_bounds = array<i64: 1, 1, 8, 256>}, {transform_indices = @transform_2, window_bounds = array<i64: 1, 1, 8, 256>}, {transform_indices = @transform_3, window_bounds = array<i64: 1, 1, 8, 128>}]} {
    %c0 = arith.constant 0 : index
    %c0_0 = arith.constant 0 : index
    %c0_1 = arith.constant 0 : index
    %c0_2 = arith.constant 0 : index
    %0 = vector.load %arg2[%c0, %c0_0, %c0_1, %c0_2] : memref<1x1x8x256xbf16, #tpu.memory_space<vmem>>, vector<1x1x8x256xbf16>
    %1 = vector.shape_cast %0 : vector<1x1x8x256xbf16> to vector<8x256xbf16>
    %2 = arith.extf %1 : vector<8x256xbf16> to vector<8x256xf32>
    %3 = vector.extract_strided_slice %2 {offsets = [0, 0], sizes = [8, 128], strides = [1, 1]} : vector<8x256xf32> to vector<8x128xf32>
    %4 = vector.extract_strided_slice %2 {offsets = [0, 128], sizes = [8, 128], strides = [1, 1]} : vector<8x256xf32> to vector<8x128xf32>
    %cst = arith.constant 0.000000e+00 : f32
    %5 = vector.broadcast %cst : f32 to vector<1x128xf32>
    %6 = vector.extract_strided_slice %4 {offsets = [0, 0], sizes = [7, 128], strides = [1, 1]} : vector<8x128xf32> to vector<7x128xf32>
    %7 = tpu.concatenate %5, %6 in 0 : vector<1x128xf32>, vector<7x128xf32> -> vector<8x128xf32>
    %8 = arith.maximumf %3, %4 : vector<8x128xf32>
    %9 = arith.maximumf %8, %7 : vector<8x128xf32>
    %c0_3 = arith.constant 0 : index
    %c0_4 = arith.constant 0 : index
    %c0_5 = arith.constant 0 : index
    %c0_6 = arith.constant 0 : index
    %10 = vector.load %arg3[%c0_3, %c0_4, %c0_5, %c0_6] : memref<1x1x8x256xbf16, #tpu.memory_space<vmem>>, vector<1x1x8x256xbf16>
    %11 = vector.shape_cast %10 : vector<1x1x8x256xbf16> to vector<8x256xbf16>
    %12 = arith.extf %11 : vector<8x256xbf16> to vector<8x256xf32>
    %13 = vector.extract_strided_slice %12 {offsets = [0, 0], sizes = [8, 128], strides = [1, 1]} : vector<8x256xf32> to vector<8x128xf32>
    %14 = vector.extract_strided_slice %12 {offsets = [0, 128], sizes = [8, 128], strides = [1, 1]} : vector<8x256xf32> to vector<8x128xf32>
    %cst_7 = arith.constant 0.000000e+00 : f32
    %15 = vector.broadcast %cst_7 : f32 to vector<1x128xf32>
    %16 = vector.extract_strided_slice %14 {offsets = [0, 0], sizes = [7, 128], strides = [1, 1]} : vector<8x128xf32> to vector<7x128xf32>
    %17 = tpu.concatenate %15, %16 in 0 : vector<1x128xf32>, vector<7x128xf32> -> vector<8x128xf32>
    %18 = arith.maximumf %13, %14 : vector<8x128xf32>
    %19 = arith.maximumf %18, %17 : vector<8x128xf32>
    %20 = arith.maximumf %9, %19 : vector<8x128xf32>
    %c0_8 = arith.constant 0 : index
    %c0_9 = arith.constant 0 : index
    %c0_10 = arith.constant 0 : index
    %c0_11 = arith.constant 0 : index
    %21 = vector.load %arg4[%c0_8, %c0_9, %c0_10, %c0_11] : memref<1x1x8x256xbf16, #tpu.memory_space<vmem>>, vector<1x1x8x256xbf16>
    %22 = vector.shape_cast %21 : vector<1x1x8x256xbf16> to vector<8x256xbf16>
    %23 = arith.extf %22 : vector<8x256xbf16> to vector<8x256xf32>
    %24 = vector.extract_strided_slice %23 {offsets = [0, 0], sizes = [8, 128], strides = [1, 1]} : vector<8x256xf32> to vector<8x128xf32>
    %25 = vector.extract_strided_slice %23 {offsets = [0, 128], sizes = [8, 128], strides = [1, 1]} : vector<8x256xf32> to vector<8x128xf32>
    %cst_12 = arith.constant 0.000000e+00 : f32
    %26 = vector.broadcast %cst_12 : f32 to vector<1x128xf32>
    %27 = vector.extract_strided_slice %25 {offsets = [0, 0], sizes = [7, 128], strides = [1, 1]} : vector<8x128xf32> to vector<7x128xf32>
    %28 = tpu.concatenate %26, %27 in 0 : vector<1x128xf32>, vector<7x128xf32> -> vector<8x128xf32>
    %29 = arith.maximumf %24, %25 : vector<8x128xf32>
    %30 = arith.maximumf %29, %28 : vector<8x128xf32>
    %31 = arith.maximumf %20, %30 : vector<8x128xf32>
    %32 = arith.truncf %31 : vector<8x128xf32> to vector<8x128xbf16>
    %c0_13 = arith.constant 0 : index
    %c0_14 = arith.constant 0 : index
    %c0_15 = arith.constant 0 : index
    %c0_16 = arith.constant 0 : index
    %33 = vector.load %arg5[%c0_13, %c0_14, %c0_15, %c0_16] : memref<1x1x8x128xbf16, #tpu.memory_space<vmem>>, vector<1x1x8x128xbf16>
    %34 = vector.shape_cast %33 : vector<1x1x8x128xbf16> to vector<8x128xbf16>
    %35 = vector.shape_cast %32 : vector<8x128xbf16> to vector<1x1x8x128xbf16>
    tpu.vector_store %arg5[%c0_13, %c0_14, %c0_15, %c0_16], %35 {strides = array<i32>} : memref<1x1x8x128xbf16, #tpu.memory_space<vmem>>, vector<1x1x8x128xbf16>,
    return
  }
  func.func @transform_0(%arg0: i32, %arg1: i32) -> (i32, i32, i32, i32) {
    %c2_i32 = arith.constant 2 : i32
    %0 = arith.muli %c2_i32, %arg1 : i32
    %c1_i32 = arith.constant 1 : i32
    %1 = arith.subi %0, %c1_i32 : i32
    %c0_i32 = arith.constant 0 : i32
    %2 = arith.maxsi %1, %c0_i32 : i32
    %c0_i32_0 = arith.constant 0 : i32
    %c0_i32_1 = arith.constant 0 : i32
    %c0_i32_2 = arith.constant 0 : i32
    return %arg0, %2, %c0_i32_0, %c0_i32_1 : i32, i32, i32, i32
  }
  func.func @transform_1(%arg0: i32, %arg1: i32) -> (i32, i32, i32, i32) {
    %c2_i32 = arith.constant 2 : i32
    %0 = arith.muli %c2_i32, %arg1 : i32
    %c0_i32 = arith.constant 0 : i32
    %c0_i32_0 = arith.constant 0 : i32
    %c0_i32_1 = arith.constant 0 : i32
    return %arg0, %0, %c0_i32, %c0_i32_0 : i32, i32, i32, i32
  }
  func.func @transform_2(%arg0: i32, %arg1: i32) -> (i32, i32, i32, i32) {
    %c2_i32 = arith.constant 2 : i32
    %0 = arith.muli %c2_i32, %arg1 : i32
    %c1_i32 = arith.constant 1 : i32
    %1 = arith.addi %0, %c1_i32 : i32
    %c0_i32 = arith.constant 0 : i32
    %c0_i32_0 = arith.constant 0 : i32
    %c0_i32_1 = arith.constant 0 : i32
    return %arg0, %1, %c0_i32, %c0_i32_0 : i32, i32, i32, i32
  }
  func.func @transform_3(%arg0: i32, %arg1: i32) -> (i32, i32, i32, i32) {
    %c0_i32 = arith.constant 0 : i32
    %c0_i32_0 = arith.constant 0 : i32
    %c0_i32_1 = arith.constant 0 : i32
    return %arg0, %arg1, %c0_i32, %c0_i32_0 : i32, i32, i32, i32
  }
}

module attributes {stable_mosaic.version = 11 : i64} {
  func.func @_res_conv1_kernel(%arg0: i32, %arg1: i32, %arg2: i32, %arg3: memref<1x1x4x256xbf16, #tpu.memory_space<vmem>>, %arg4: memref<3x384x128xbf16, #tpu.memory_space<vmem>>, %arg5: memref<1x128xf32, #tpu.memory_space<vmem>>, %arg6: memref<1x128xf32, #tpu.memory_space<vmem>>, %arg7: memref<1x1x4x128xbf16, #tpu.memory_space<vmem>>, %arg8: memref<4x128xf32, #tpu.memory_space<vmem>>) attributes {dimension_semantics = [#tpu.dimension_semantics<parallel>, #tpu.dimension_semantics<arbitrary>, #tpu.dimension_semantics<arbitrary>], iteration_bounds = array<i64: 2, 4, 3>, scalar_prefetch = 0 : i64, scratch_operands = 1 : i64, tpu.core_type = #tpu.core_type<tc>, window_params = [{transform_indices = @transform_0, window_bounds = array<i64: 1, 1, 4, 256>}, {pipeline_mode = #tpu.pipeline_mode<synchronous>, transform_indices = @transform_1, window_bounds = array<i64: 3, 384, 128>}, {pipeline_mode = #tpu.pipeline_mode<synchronous>, transform_indices = @transform_2, window_bounds = array<i64: 1, 128>}, {pipeline_mode = #tpu.pipeline_mode<synchronous>, transform_indices = @transform_3, window_bounds = array<i64: 1, 128>}, {transform_indices = @transform_4, window_bounds = array<i64: 1, 1, 4, 128>}]} {
    %c0_i32 = arith.constant 0 : i32
    %0 = arith.cmpi eq, %arg2, %c0_i32 : i32
    %1 = arith.extui %0 : i1 to i32
    %c0_i32_0 = arith.constant 0 : i32
    %2 = arith.cmpi ne, %1, %c0_i32_0 : i32
    scf.if %2 {
      %cst = arith.constant 0.000000e+00 : f32
      %12 = vector.broadcast %cst : f32 to vector<4x128xf32>
      %c0 = arith.constant 0 : index
      %c0_5 = arith.constant 0 : index
      %13 = vector.load %arg8[%c0, %c0_5] : memref<4x128xf32, #tpu.memory_space<vmem>>, vector<4x128xf32>
      tpu.vector_store %arg8[%c0, %c0_5], %12 {strides = array<i32>} : memref<4x128xf32, #tpu.memory_space<vmem>>, vector<4x128xf32>,
    } else {
    }
    %c0_i32_1 = arith.constant 0 : i32
    %3 = arith.cmpi eq, %arg1, %c0_i32_1 : i32
    %c0_i32_2 = arith.constant 0 : i32
    %4 = arith.cmpi eq, %arg2, %c0_i32_2 : i32
    %5 = arith.andi %3, %4 : i1
    %true = arith.constant true
    %6 = arith.xori %5, %true : i1
    %7 = arith.extui %6 : i1 to i32
    %c0_i32_3 = arith.constant 0 : i32
    %8 = arith.cmpi ne, %7, %c0_i32_3 : i32
    scf.if %8 {
      %c0 = arith.constant 0 : index
      %c0_5 = arith.constant 0 : index
      %c0_6 = arith.constant 0 : index
      %c0_7 = arith.constant 0 : index
      %12 = vector.load %arg3[%c0, %c0_5, %c0_6, %c0_7] : memref<1x1x4x256xbf16, #tpu.memory_space<vmem>>, vector<1x1x4x256xbf16>
      %13 = vector.shape_cast %12 : vector<1x1x4x256xbf16> to vector<4x256xbf16>
      %14 = arith.extf %13 : vector<4x256xbf16> to vector<4x256xf32>
      %15 = vector.extract_strided_slice %14 {offsets = [0, 0], sizes = [4, 128], strides = [1, 1]} : vector<4x256xf32> to vector<4x128xf32>
      %16 = vector.extract_strided_slice %14 {offsets = [0, 128], sizes = [4, 128], strides = [1, 1]} : vector<4x256xf32> to vector<4x128xf32>
      %cst = arith.constant 0.000000e+00 : f32
      %17 = vector.broadcast %cst : f32 to vector<1x128xf32>
      %18 = vector.extract_strided_slice %16 {offsets = [0, 0], sizes = [3, 128], strides = [1, 1]} : vector<4x128xf32> to vector<3x128xf32>
      %19 = tpu.concatenate %17, %18 in 0 : vector<1x128xf32>, vector<3x128xf32> -> vector<4x128xf32>
      %20 = tpu.concatenate %19, %15, %16 in 1 : vector<4x128xf32>, vector<4x128xf32>, vector<4x128xf32> -> vector<4x384xf32>
      %21 = arith.truncf %20 : vector<4x384xf32> to vector<4x384xbf16>
      %c0_8 = arith.constant 0 : index
      %c0_9 = arith.constant 0 : index
      %22 = vector.load %arg8[%c0_8, %c0_9] : memref<4x128xf32, #tpu.memory_space<vmem>>, vector<4x128xf32>
      %23 = arith.index_cast %arg2 : i32 to index
      %c0_10 = arith.constant 0 : index
      %c0_11 = arith.constant 0 : index
      %24 = vector.load %arg4[%23, %c0_10, %c0_11] : memref<3x384x128xbf16, #tpu.memory_space<vmem>>, vector<1x384x128xbf16>
      %25 = vector.shape_cast %24 : vector<1x384x128xbf16> to vector<384x128xbf16>
      %cst_12 = arith.constant dense<0.000000e+00> : vector<4x128xf32>
      %26 = tpu.matmul %21, %25, %cst_12 {dimension_numbers = #tpu.dot_dimension_numbers<[1], [0], [0], [1], [0, 0, 1, 1], [], []>} : vector<4x384xbf16>, vector<384x128xbf16>, vector<4x128xf32> -> vector<4x128xf32>
      %27 = arith.addf %22, %26 : vector<4x128xf32>
      %c0_13 = arith.constant 0 : index
      %c0_14 = arith.constant 0 : index
      %28 = vector.load %arg8[%c0_13, %c0_14] : memref<4x128xf32, #tpu.memory_space<vmem>>, vector<4x128xf32>
      tpu.vector_store %arg8[%c0_13, %c0_14], %27 {strides = array<i32>} : memref<4x128xf32, #tpu.memory_space<vmem>>, vector<4x128xf32>,
    } else {
    }
    %c2_i32 = arith.constant 2 : i32
    %9 = arith.cmpi eq, %arg2, %c2_i32 : i32
    %10 = arith.extui %9 : i1 to i32
    %c0_i32_4 = arith.constant 0 : i32
    %11 = arith.cmpi ne, %10, %c0_i32_4 : i32
    scf.if %11 {
      %c0 = arith.constant 0 : index
      %c0_5 = arith.constant 0 : index
      %12 = vector.load %arg8[%c0, %c0_5] : memref<4x128xf32, #tpu.memory_space<vmem>>, vector<4x128xf32>
      %c0_6 = arith.constant 0 : index
      %c0_7 = arith.constant 0 : index
      %13 = vector.load %arg5[%c0_6, %c0_7] : memref<1x128xf32, #tpu.memory_space<vmem>>, vector<1x128xf32>
      %14 = vector.broadcast %13 : vector<1x128xf32> to vector<4x128xf32>
      %15 = arith.mulf %12, %14 : vector<4x128xf32>
      %c0_8 = arith.constant 0 : index
      %c0_9 = arith.constant 0 : index
      %16 = vector.load %arg6[%c0_8, %c0_9] : memref<1x128xf32, #tpu.memory_space<vmem>>, vector<1x128xf32>
      %17 = vector.broadcast %16 : vector<1x128xf32> to vector<4x128xf32>
      %18 = arith.addf %15, %17 : vector<4x128xf32>
      %cst = arith.constant 0.000000e+00 : f32
      %19 = vector.broadcast %cst : f32 to vector<4x128xf32>
      %20 = arith.maximumf %18, %19 : vector<4x128xf32>
      %21 = arith.truncf %20 : vector<4x128xf32> to vector<4x128xbf16>
      %c0_10 = arith.constant 0 : index
      %c0_11 = arith.constant 0 : index
      %c0_12 = arith.constant 0 : index
      %c0_13 = arith.constant 0 : index
      %22 = vector.load %arg7[%c0_10, %c0_11, %c0_12, %c0_13] : memref<1x1x4x128xbf16, #tpu.memory_space<vmem>>, vector<1x1x4x128xbf16>
      %23 = vector.shape_cast %22 : vector<1x1x4x128xbf16> to vector<4x128xbf16>
      %24 = vector.shape_cast %21 : vector<4x128xbf16> to vector<1x1x4x128xbf16>
      tpu.vector_store %arg7[%c0_10, %c0_11, %c0_12, %c0_13], %24 {strides = array<i32>} : memref<1x1x4x128xbf16, #tpu.memory_space<vmem>>, vector<1x1x4x128xbf16>,
    } else {
    }
    return
  }
  func.func @transform_0(%arg0: i32, %arg1: i32, %arg2: i32) -> (i32, i32, i32, i32) {
    %c2_i32 = arith.constant 2 : i32
    %0 = arith.muli %c2_i32, %arg1 : i32
    %1 = arith.addi %0, %arg2 : i32
    %c1_i32 = arith.constant 1 : i32
    %2 = arith.subi %1, %c1_i32 : i32
    %c0_i32 = arith.constant 0 : i32
    %3 = arith.maxsi %2, %c0_i32 : i32
    %c0_i32_0 = arith.constant 0 : i32
    %c0_i32_1 = arith.constant 0 : i32
    %c0_i32_2 = arith.constant 0 : i32
    return %arg0, %3, %c0_i32_0, %c0_i32_1 : i32, i32, i32, i32
  }
  func.func @transform_1(%arg0: i32, %arg1: i32, %arg2: i32) -> (i32, i32, i32) {
    %c0_i32 = arith.constant 0 : i32
    %c0_i32_0 = arith.constant 0 : i32
    %c0_i32_1 = arith.constant 0 : i32
    %c0_i32_2 = arith.constant 0 : i32
    return %c0_i32, %c0_i32_0, %c0_i32_1 : i32, i32, i32
  }
  func.func @transform_2(%arg0: i32, %arg1: i32, %arg2: i32) -> (i32, i32) {
    %c0_i32 = arith.constant 0 : i32
    %c0_i32_0 = arith.constant 0 : i32
    %c0_i32_1 = arith.constant 0 : i32
    return %c0_i32, %c0_i32_0 : i32, i32
  }
  func.func @transform_3(%arg0: i32, %arg1: i32, %arg2: i32) -> (i32, i32) {
    %c0_i32 = arith.constant 0 : i32
    %c0_i32_0 = arith.constant 0 : i32
    %c0_i32_1 = arith.constant 0 : i32
    return %c0_i32, %c0_i32_0 : i32, i32
  }
  func.func @transform_4(%arg0: i32, %arg1: i32, %arg2: i32) -> (i32, i32, i32, i32) {
    %c0_i32 = arith.constant 0 : i32
    %c0_i32_0 = arith.constant 0 : i32
    %c0_i32_1 = arith.constant 0 : i32
    return %arg0, %arg1, %c0_i32, %c0_i32_0 : i32, i32, i32, i32
  }
}

module attributes {stable_mosaic.version = 11 : i64} {
  func.func @_res_conv2_kernel(%arg0: i32, %arg1: i32, %arg2: i32, %arg3: memref<1x1x4x128xbf16, #tpu.memory_space<vmem>>, %arg4: memref<1x1x4x256xbf16, #tpu.memory_space<vmem>>, %arg5: memref<3x384x128xbf16, #tpu.memory_space<vmem>>, %arg6: memref<128x128xbf16, #tpu.memory_space<vmem>>, %arg7: memref<1x128xf32, #tpu.memory_space<vmem>>, %arg8: memref<1x128xf32, #tpu.memory_space<vmem>>, %arg9: memref<1x1x128xf32, #tpu.memory_space<vmem>>, %arg10: memref<4x128xf32, #tpu.memory_space<vmem>>) attributes {dimension_semantics = [#tpu.dimension_semantics<parallel>, #tpu.dimension_semantics<arbitrary>, #tpu.dimension_semantics<arbitrary>], iteration_bounds = array<i64: 2, 4, 3>, scalar_prefetch = 0 : i64, scratch_operands = 1 : i64, tpu.core_type = #tpu.core_type<tc>, window_params = [{transform_indices = @transform_0, window_bounds = array<i64: 1, 1, 4, 128>}, {transform_indices = @transform_1, window_bounds = array<i64: 1, 1, 4, 256>}, {pipeline_mode = #tpu.pipeline_mode<synchronous>, transform_indices = @transform_2, window_bounds = array<i64: 3, 384, 128>}, {pipeline_mode = #tpu.pipeline_mode<synchronous>, transform_indices = @transform_3, window_bounds = array<i64: 128, 128>}, {pipeline_mode = #tpu.pipeline_mode<synchronous>, transform_indices = @transform_4, window_bounds = array<i64: 1, 128>}, {pipeline_mode = #tpu.pipeline_mode<synchronous>, transform_indices = @transform_5, window_bounds = array<i64: 1, 128>}, {transform_indices = @transform_6, window_bounds = array<i64: 1, 1, 128>}]} {
    %c0_i32 = arith.constant 0 : i32
    %0 = arith.cmpi eq, %arg1, %c0_i32 : i32
    %c0_i32_0 = arith.constant 0 : i32
    %1 = arith.cmpi eq, %arg2, %c0_i32_0 : i32
    %2 = arith.andi %0, %1 : i1
    %3 = arith.extui %2 : i1 to i32
    %c0_i32_1 = arith.constant 0 : i32
    %4 = arith.cmpi ne, %3, %c0_i32_1 : i32
    scf.if %4 {
      %cst = arith.constant 0.000000e+00 : f32
      %18 = vector.broadcast %cst : f32 to vector<1x1x128xf32>
      %c0 = arith.constant 0 : index
      %c0_7 = arith.constant 0 : index
      %c0_8 = arith.constant 0 : index
      %19 = vector.load %arg9[%c0, %c0_7, %c0_8] : memref<1x1x128xf32, #tpu.memory_space<vmem>>, vector<1x1x128xf32>
      tpu.vector_store %arg9[%c0, %c0_7, %c0_8], %18 {strides = array<i32>} : memref<1x1x128xf32, #tpu.memory_space<vmem>>, vector<1x1x128xf32>,
    } else {
    }
    %c0_i32_2 = arith.constant 0 : i32
    %5 = arith.cmpi eq, %arg2, %c0_i32_2 : i32
    %6 = arith.extui %5 : i1 to i32
    %c0_i32_3 = arith.constant 0 : i32
    %7 = arith.cmpi ne, %6, %c0_i32_3 : i32
    scf.if %7 {
      %c0 = arith.constant 0 : index
      %c0_7 = arith.constant 0 : index
      %c0_8 = arith.constant 0 : index
      %c0_9 = arith.constant 0 : index
      %18 = vector.load %arg4[%c0, %c0_7, %c0_8, %c0_9] : memref<1x1x4x256xbf16, #tpu.memory_space<vmem>>, vector<1x1x4x256xbf16>
      %19 = vector.shape_cast %18 : vector<1x1x4x256xbf16> to vector<4x256xbf16>
      %20 = vector.extract_strided_slice %19 {offsets = [0, 0], sizes = [4, 128], strides = [1, 1]} : vector<4x256xbf16> to vector<4x128xbf16>
      %c0_10 = arith.constant 0 : index
      %c0_11 = arith.constant 0 : index
      %21 = vector.load %arg6[%c0_10, %c0_11] : memref<128x128xbf16, #tpu.memory_space<vmem>>, vector<128x128xbf16>
      %cst = arith.constant dense<0.000000e+00> : vector<4x128xf32>
      %22 = tpu.matmul %20, %21, %cst {dimension_numbers = #tpu.dot_dimension_numbers<[1], [0], [0], [1], [0, 0, 1, 1], [], []>} : vector<4x128xbf16>, vector<128x128xbf16>, vector<4x128xf32> -> vector<4x128xf32>
      %c0_12 = arith.constant 0 : index
      %c0_13 = arith.constant 0 : index
      %23 = vector.load %arg10[%c0_12, %c0_13] : memref<4x128xf32, #tpu.memory_space<vmem>>, vector<4x128xf32>
      tpu.vector_store %arg10[%c0_12, %c0_13], %22 {strides = array<i32>} : memref<4x128xf32, #tpu.memory_space<vmem>>, vector<4x128xf32>,
    } else {
    }
    %8 = arith.addi %arg1, %arg2 : i32
    %c1_i32 = arith.constant 1 : i32
    %9 = arith.subi %8, %c1_i32 : i32
    %c0_i32_4 = arith.constant 0 : i32
    %10 = arith.cmpi sge, %9, %c0_i32_4 : i32
    %c3_i32 = arith.constant 3 : i32
    %11 = arith.cmpi sle, %9, %c3_i32 : i32
    %12 = arith.andi %10, %11 : i1
    %13 = arith.extui %12 : i1 to i32
    %c0_i32_5 = arith.constant 0 : i32
    %14 = arith.cmpi ne, %13, %c0_i32_5 : i32
    scf.if %14 {
      %c0 = arith.constant 0 : index
      %c0_7 = arith.constant 0 : index
      %c0_8 = arith.constant 0 : index
      %c0_9 = arith.constant 0 : index
      %18 = vector.load %arg3[%c0, %c0_7, %c0_8, %c0_9] : memref<1x1x4x128xbf16, #tpu.memory_space<vmem>>, vector<1x1x4x128xbf16>
      %19 = vector.shape_cast %18 : vector<1x1x4x128xbf16> to vector<4x128xbf16>
      %20 = arith.extf %19 : vector<4x128xbf16> to vector<4x128xf32>
      %cst = arith.constant 0.000000e+00 : f32
      %21 = vector.broadcast %cst : f32 to vector<1x128xf32>
      %22 = vector.extract_strided_slice %20 {offsets = [0, 0], sizes = [3, 128], strides = [1, 1]} : vector<4x128xf32> to vector<3x128xf32>
      %23 = tpu.concatenate %21, %22 in 0 : vector<1x128xf32>, vector<3x128xf32> -> vector<4x128xf32>
      %24 = vector.extract_strided_slice %20 {offsets = [1, 0], sizes = [3, 128], strides = [1, 1]} : vector<4x128xf32> to vector<3x128xf32>
      %25 = tpu.concatenate %24, %21 in 0 : vector<3x128xf32>, vector<1x128xf32> -> vector<4x128xf32>
      %26 = tpu.concatenate %23, %20, %25 in 1 : vector<4x128xf32>, vector<4x128xf32>, vector<4x128xf32> -> vector<4x384xf32>
      %27 = arith.truncf %26 : vector<4x384xf32> to vector<4x384xbf16>
      %c0_10 = arith.constant 0 : index
      %c0_11 = arith.constant 0 : index
      %28 = vector.load %arg10[%c0_10, %c0_11] : memref<4x128xf32, #tpu.memory_space<vmem>>, vector<4x128xf32>
      %29 = arith.index_cast %arg2 : i32 to index
      %c0_12 = arith.constant 0 : index
      %c0_13 = arith.constant 0 : index
      %30 = vector.load %arg5[%29, %c0_12, %c0_13] : memref<3x384x128xbf16, #tpu.memory_space<vmem>>, vector<1x384x128xbf16>
      %31 = vector.shape_cast %30 : vector<1x384x128xbf16> to vector<384x128xbf16>
      %cst_14 = arith.constant dense<0.000000e+00> : vector<4x128xf32>
      %32 = tpu.matmul %27, %31, %cst_14 {dimension_numbers = #tpu.dot_dimension_numbers<[1], [0], [0], [1], [0, 0, 1, 1], [], []>} : vector<4x384xbf16>, vector<384x128xbf16>, vector<4x128xf32> -> vector<4x128xf32>
      %33 = arith.addf %28, %32 : vector<4x128xf32>
      %c0_15 = arith.constant 0 : index
      %c0_16 = arith.constant 0 : index
      %34 = vector.load %arg10[%c0_15, %c0_16] : memref<4x128xf32, #tpu.memory_space<vmem>>, vector<4x128xf32>
      tpu.vector_store %arg10[%c0_15, %c0_16], %33 {strides = array<i32>} : memref<4x128xf32, #tpu.memory_space<vmem>>, vector<4x128xf32>,
    } else {
    }
    %c2_i32 = arith.constant 2 : i32
    %15 = arith.cmpi eq, %arg2, %c2_i32 : i32
    %16 = arith.extui %15 : i1 to i32
    %c0_i32_6 = arith.constant 0 : i32
    %17 = arith.cmpi ne, %16, %c0_i32_6 : i32
    scf.if %17 {
      %c0 = arith.constant 0 : index
      %c0_7 = arith.constant 0 : index
      %18 = vector.load %arg10[%c0, %c0_7] : memref<4x128xf32, #tpu.memory_space<vmem>>, vector<4x128xf32>
      %c0_8 = arith.constant 0 : index
      %c0_9 = arith.constant 0 : index
      %19 = vector.load %arg7[%c0_8, %c0_9] : memref<1x128xf32, #tpu.memory_space<vmem>>, vector<1x128xf32>
      %20 = vector.broadcast %19 : vector<1x128xf32> to vector<4x128xf32>
      %21 = arith.mulf %18, %20 : vector<4x128xf32>
      %c0_10 = arith.constant 0 : index
      %c0_11 = arith.constant 0 : index
      %22 = vector.load %arg8[%c0_10, %c0_11] : memref<1x128xf32, #tpu.memory_space<vmem>>, vector<1x128xf32>
      %23 = vector.broadcast %22 : vector<1x128xf32> to vector<4x128xf32>
      %24 = arith.addf %21, %23 : vector<4x128xf32>
      %cst = arith.constant 0.000000e+00 : f32
      %25 = vector.broadcast %cst : f32 to vector<4x128xf32>
      %26 = arith.maximumf %24, %25 : vector<4x128xf32>
      %c0_12 = arith.constant 0 : index
      %c0_13 = arith.constant 0 : index
      %c0_14 = arith.constant 0 : index
      %27 = vector.load %arg9[%c0_12, %c0_13, %c0_14] : memref<1x1x128xf32, #tpu.memory_space<vmem>>, vector<1x1x128xf32>
      %cst_15 = arith.constant dense<0.000000e+00> : vector<128xf32>
      %28 = vector.multi_reduction <add>, %26, %cst_15 [0] : vector<4x128xf32> to vector<128xf32>
      %29 = vector.shape_cast %28 : vector<128xf32> to vector<1x128xf32>
      %30 = vector.shape_cast %29 : vector<1x128xf32> to vector<1x1x128xf32>
      %31 = arith.addf %27, %30 : vector<1x1x128xf32>
      %c0_16 = arith.constant 0 : index
      %c0_17 = arith.constant 0 : index
      %c0_18 = arith.constant 0 : index
      %32 = vector.load %arg9[%c0_16, %c0_17, %c0_18] : memref<1x1x128xf32, #tpu.memory_space<vmem>>, vector<1x1x128xf32>
      tpu.vector_store %arg9[%c0_16, %c0_17, %c0_18], %31 {strides = array<i32>} : memref<1x1x128xf32, #tpu.memory_space<vmem>>, vector<1x1x128xf32>,
    } else {
    }
    return
  }
  func.func @transform_0(%arg0: i32, %arg1: i32, %arg2: i32) -> (i32, i32, i32, i32) {
    %0 = arith.addi %arg1, %arg2 : i32
    %c1_i32 = arith.constant 1 : i32
    %1 = arith.subi %0, %c1_i32 : i32
    %c0_i32 = arith.constant 0 : i32
    %2 = arith.maxsi %1, %c0_i32 : i32
    %c3_i32 = arith.constant 3 : i32
    %3 = arith.minsi %2, %c3_i32 : i32
    %c0_i32_0 = arith.constant 0 : i32
    %c0_i32_1 = arith.constant 0 : i32
    %c0_i32_2 = arith.constant 0 : i32
    return %arg0, %3, %c0_i32_0, %c0_i32_1 : i32, i32, i32, i32
  }
  func.func @transform_1(%arg0: i32, %arg1: i32, %arg2: i32) -> (i32, i32, i32, i32) {
    %c2_i32 = arith.constant 2 : i32
    %0 = arith.muli %c2_i32, %arg1 : i32
    %c0_i32 = arith.constant 0 : i32
    %c0_i32_0 = arith.constant 0 : i32
    %c0_i32_1 = arith.constant 0 : i32
    return %arg0, %0, %c0_i32, %c0_i32_0 : i32, i32, i32, i32
  }
  func.func @transform_2(%arg0: i32, %arg1: i32, %arg2: i32) -> (i32, i32, i32) {
    %c0_i32 = arith.constant 0 : i32
    %c0_i32_0 = arith.constant 0 : i32
    %c0_i32_1 = arith.constant 0 : i32
    %c0_i32_2 = arith.constant 0 : i32
    return %c0_i32, %c0_i32_0, %c0_i32_1 : i32, i32, i32
  }
  func.func @transform_3(%arg0: i32, %arg1: i32, %arg2: i32) -> (i32, i32) {
    %c0_i32 = arith.constant 0 : i32
    %c0_i32_0 = arith.constant 0 : i32
    %c0_i32_1 = arith.constant 0 : i32
    return %c0_i32, %c0_i32_0 : i32, i32
  }
  func.func @transform_4(%arg0: i32, %arg1: i32, %arg2: i32) -> (i32, i32) {
    %c0_i32 = arith.constant 0 : i32
    %c0_i32_0 = arith.constant 0 : i32
    %c0_i32_1 = arith.constant 0 : i32
    return %c0_i32, %c0_i32_0 : i32, i32
  }
  func.func @transform_5(%arg0: i32, %arg1: i32, %arg2: i32) -> (i32, i32) {
    %c0_i32 = arith.constant 0 : i32
    %c0_i32_0 = arith.constant 0 : i32
    %c0_i32_1 = arith.constant 0 : i32
    return %c0_i32, %c0_i32_0 : i32, i32
  }
  func.func @transform_6(%arg0: i32, %arg1: i32, %arg2: i32) -> (i32, i32, i32) {
    %c0_i32 = arith.constant 0 : i32
    %c0_i32_0 = arith.constant 0 : i32
    %c0_i32_1 = arith.constant 0 : i32
    return %arg0, %c0_i32, %c0_i32_0 : i32, i32, i32
  }
}

module attributes {stable_mosaic.version = 11 : i64} {
  func.func @_fc_kernel(%arg0: memref<2x128xf32, #tpu.memory_space<vmem>>, %arg1: memref<128x128xf32, #tpu.memory_space<vmem>>, %arg2: memref<1x128xf32, #tpu.memory_space<vmem>>, %arg3: memref<2x128xf32, #tpu.memory_space<vmem>>) attributes {dimension_semantics = [], scalar_prefetch = 0 : i64, scratch_operands = 0 : i64, tpu.core_type = #tpu.core_type<tc>} {
    %c0 = arith.constant 0 : index
    %c0_0 = arith.constant 0 : index
    %0 = vector.load %arg0[%c0, %c0_0] : memref<2x128xf32, #tpu.memory_space<vmem>>, vector<2x128xf32>
    %c0_1 = arith.constant 0 : index
    %c0_2 = arith.constant 0 : index
    %1 = vector.load %arg1[%c0_1, %c0_2] : memref<128x128xf32, #tpu.memory_space<vmem>>, vector<128x128xf32>
    %cst = arith.constant dense<0.000000e+00> : vector<2x128xf32>
    %2 = tpu.matmul %0, %1, %cst {dimension_numbers = #tpu.dot_dimension_numbers<[1], [0], [0], [1], [0, 0, 1, 1], [], []>} : vector<2x128xf32>, vector<128x128xf32>, vector<2x128xf32> -> vector<2x128xf32>
    %c0_3 = arith.constant 0 : index
    %c0_4 = arith.constant 0 : index
    %3 = vector.load %arg2[%c0_3, %c0_4] : memref<1x128xf32, #tpu.memory_space<vmem>>, vector<1x128xf32>
    %4 = vector.broadcast %3 : vector<1x128xf32> to vector<2x128xf32>
    %5 = arith.addf %2, %4 : vector<2x128xf32>
    %c0_5 = arith.constant 0 : index
    %c0_6 = arith.constant 0 : index
    %6 = vector.load %arg3[%c0_5, %c0_6] : memref<2x128xf32, #tpu.memory_space<vmem>>, vector<2x128xf32>
    tpu.vector_store %arg3[%c0_5, %c0_6], %5 {strides = array<i32>} : memref<2x128xf32, #tpu.memory_space<vmem>>, vector<2x128xf32>,
    return
  }
}

</mosaic_0001>

<bundles_post_ra>
// kernel: resnet_forward.6
= control target key start
LH: loop header
LB: loop body
LE: loop exit
PB: predicated region body
PF: predicated region fallthrough
CT: control target
= control target key end

     0   :  { %s622_s12 = smov 0   ;;  %s624_s13 = smov 0   ;;  %s691_s0 = inlined_call_operand.vmem [shape: bf16[2,16,8,256], index: 0, kind: input, shape index: {}, may-alias: {0,1,2}]   ;;  %s692_s1 = inlined_call_operand.vmem [shape: bf16[2,16,8,256], index: 1, kind: input, shape index: {}, may-alias: {0,1,2}]   ;;  %s693_s2 = inlined_call_operand.vmem [shape: bf16[2,16,8,256], index: 2, kind: input, shape index: {}, may-alias: {0,1,2}]   ;;  %s694_s3 = inlined_call_operand.vmem [shape: bf16[2,8,8,128], index: 3, kind: output, shape index: {}]  }
   0x1   :  { %s626_s14 = smov 0   ;;  %s628_s15 = smov 0  }
   0x2   :  { %s630_s16 = smov 0  }
   0x3 LB: > { %s22_s17 = sadd.s32 1, %s592_s14  ;;  %s25_s18 = sadd.s32 1, %s596_s15  ;;  %s600_s16 = sphi %s630_s16, %s13_s16   ;;  %s596_s15 = sphi %s628_s15, %s698_s15   ;;  %s592_s14 = sphi %s626_s14, %s697_s14   ;;  %s588_s13 = sphi %s624_s13, %s696_s13   ;;  %s584_s12 = sphi %s622_s12, %s695_s12  }
   0x4   : > { %p23_p0 = scmp.ge.s32.totalorder %s22_s17, 8  ;;  %p497_p1 = scmp.ge.s32.totalorder %s600_s16, 1 }
   0x5   : > { %p217_p2 = scmp.lt.s32.totalorder %s600_s16, 17 }
   0x6   : > { %s700_s17 = smov (%p23_p0, %s22_s17), 0  ;;  %s702_s18 = smov (!%p23_p0, %s25_s18), %s596_s15 }
   0x7   : > { %p218_p3 = pnand %p497_p1, %p217_p2  ;;  %p27_p4 = scmp.ge.s32.totalorder %s702_s18, 2 }
   0x8   : > { %s498_s19 = sshll.u32 (!%p218_p3), %s584_s12, 1  ;;  %p277_p5 = scmp.lt.s32.totalorder (!%p218_p3), %s588_s13, 1 }
   0x9   : > { %s704_s18 = smov (%p27_p4, %s702_s18), 0  ;;  %221 = sbr.rel (%p218_p3) target bundleno = 38 (0x26), region = 32 }
   0xa   : > { %s499_s20 = sadd.s32 (!%p218_p3), 4294967295, %s498_s19  ;;  %p293_p6 = scmp.lt.s32.totalorder (!%p218_p3), %s498_s19, 15 }
   0xb   : > { %p275_p7 = scmp.gt.s32.totalorder (!%p218_p3), %s499_s20, 0  ;;  %p500_p8 = scmp.lt.s32.totalorder (!%p218_p3), %s499_s20, 15 }
   0xc   : > { %s302_s22 = sadd.s32 (!%p218_p3), 1, %s498_s19  ;;  %p316_p10 = scmp.lt.s32.totalorder (!%p218_p3), %s584_s12, 7 }
   0xd   : > { %p305_p9 = scmp.lt.s32.totalorder (!%p218_p3), %s302_s22, 15 }
   0xe   : > { %s706_s13 = smov (!%p277_p5, %s588_s13), 1  ;;  %s708_s20 = smov (!%p275_p7, %s499_s20), 0  ;;  %vm328_vm0 = vcmask 1040384  }
   0xf   : > { %s506_s21 = sshll.u32 %s706_s13, 5  ;;  %s710_s20 = smov (!%p500_p8, %s708_s20), 15 }
  0x10   : > { %s712_s19 = smov (!%p293_p6, %s498_s19), 15  ;;  %s505_s23 = sshll.u32 %s710_s20, 1 }
  0x11   : > { %s283_s24 = sadd.s32 %s506_s21, %s505_s23  ;;  %s509_s25 = sshll.u32 %s712_s19, 1 }
  0x12   : > { %s507_s26 = sshll.u32 %s283_s24, 2  ;;  %s297_s27 = sadd.s32 %s509_s25, %s506_s21 }
  0x13   : > { %s285_s30 = scalar_lea.vmem %s691_s0, %s507_s26  ;;  %s511_s4 = sshll.u32 %s297_s27, 2 }
  0x14   : > { %s299_s7 = scalar_lea.vmem %s692_s1, %s511_s4  ;;  %v322_v0 = vld [vmem:[%s285_s30] sm:$0xff]  ;;  %s714_s22 = smov (!%p305_p9, %s302_s22), 15 }
  0x15   : > { %v323_v1 = vunpack.c.l.bf16 %v322_v0  ;;  %v324_v2 = vunpack.c.h.bf16 %v322_v0  ;;  %v332_v3 = vld [vmem:[%s299_s7] sm:$0xff]  ;;  %s716_s12 = smov (!%p316_p10, %s584_s12), 7  ;;  %s513_s8 = sshll.u32 %s714_s22, 1 }
  0x16   : > { %v333_v4 = vunpack.c.l.bf16 %v332_v3  ;;  %v334_v5 = vunpack.c.h.bf16 %v332_v3  ;;  %s309_s9 = sadd.s32 %s513_s8, %s506_s21  ;;  %s516_s23 = sshll.u32 %s706_s13, 3 }
  0x17   : > { %v326_v6 = vrot.slane %v324_v2, 7  ;;  %v330_v7 = vmax.f32 %v323_v1, %v324_v2  ;;  %s515_s10 = sshll.u32 %s309_s9, 2  ;;  %s319_s22 = sadd.s32 %s516_s23, %s716_s12 }
  0x18   : > { %v336_v8 = vrot.slane %v334_v5, 7  ;;  %v339_v9 = vmax.f32 %v333_v4, %v334_v5  ;;  %s311_s20 = scalar_lea.vmem %s693_s2, %s515_s10  ;;  %s517_s21 = sshll.u32 %s319_s22, 2 }
  0x19   : > { %v329_v10 = vsel %vm328_vm0, 0.0, %v326_v6  ;;  %v342_v14 = vld [vmem:[%s311_s20] sm:$0xff]  ;;  %s321_s26 = scalar_lea.vmem %s694_s3, %s517_s21 }
  0x1a   : > { %v338_v11 = vsel %vm328_vm0, 0.0, %v336_v8  ;;  %v331_v12 = vmax.f32 %v330_v7, %v329_v10  ;;  %v343_v15 = vunpack.c.l.bf16 %v342_v14  ;;  %v344_v16 = vunpack.c.h.bf16 %v342_v14 }
  0x1b   : > { %v340_v13 = vmax.f32 %v339_v9, %v338_v11 }
  0x1c   : > { %v346_v17 = vrot.slane %v344_v16, 7  ;;  %v349_v18 = vmax.f32 %v343_v15, %v344_v16 }
  0x1d   : > { %v341_v19 = vmax.f32 %v331_v12, %v340_v13 }
  0x1e   : > { %v348_v20 = vsel %vm328_vm0, 0.0, %v346_v17 }
  0x1f   : > { %v350_v21 = vmax.f32 %v349_v18, %v348_v20 }
  0x21   : > { %v351_v22 = vmax.f32 %v341_v19, %v350_v21 }
  0x23   : > { %v352_v23 = vpack.c.bf16 %v351_v22, %v351_v22 }
  0x25   : > { %353 = vst [vmem:[%s321_s26] sm:$0xf] %v352_v23 }
  0x26 PF: > { %s13_s16 = sadd.s32 1, %s600_s16   ;;  %s695_s12 = smov %s592_s14 }
  0x27   : > { %p10_p11 = scmp.ge.s32.totalorder %s13_s16, 18   ;;  %s696_s13 = smov %s596_s15 }
  0x28   : > { %s697_s14 = smov %s700_s17  ;;  %s698_s15 = smov %s704_s18 }
  0x29   :  { %12 = sbr.rel (!%p10_p11) target bundleno = 3 (0x3), region = 68 }

// kernel: resnet_forward.5
= control target key start
LH: loop header
LB: loop body
LE: loop exit
PB: predicated region body
PF: predicated region fallthrough
CT: control target
= control target key end

     0   :  { %s1070_s12 = smov 0   ;;  %s1186_s0 = inlined_call_operand.vmem [shape: bf16[512,16], index: 0, kind: input, shape index: {}]   ;;  %s1187_s1 = inlined_call_operand.vmem [shape: bf16[16,128], index: 1, kind: input, shape index: {}]   ;;  %s1188_s2 = inlined_call_operand.vmem [shape: f32[1,128], index: 2, kind: input, shape index: {}]   ;;  %s1189_s3 = inlined_call_operand.vmem [shape: bf16[512,128], index: 3, kind: output, shape index: {}]  }
   0x1 LB: > { %s760_s13 = sadd.s32 4294967295, %s1048_s12   ;;  %p764_p0 = scmp.ge.s32.totalorder %s1048_s12, 1  ;;  %s1048_s12 = sphi %s1070_s12, %s13_s12  }
   0x2   : > { %p138_p1 = scmp.lt.s32.totalorder %s1048_s12, 3 }
   0x4   : > { %p139_p2 = pnand %p764_p0, %p138_p1 }
   0x5   : > { %s765_s16 = sshll.u32 (!%p139_p2), %s760_s13, 5 }
   0x6   : > { %142 = sbr.rel (%p139_p2) target bundleno = 247 (0xf7), region = 32  ;;  %p163_p3 = scmp.lt.s32.totalorder (!%p139_p2), %s765_s16, 63 }
   0xb   : > { %v1025_v0 = vld [vmem:[%s1187_s1] sm:$0xff]   ;;  %s1191_s16 = smov (!%p163_p3, %s765_s16), 63  ;;  %vm302_vm0 = vcmask 130048  }
   0xc   : > { %981 = vmatprep.subr.bf16.mxu0 %v1025_v0  ;;  %1015 = vmatprep.subr.bf16.mxu1 %v1025_v0  ;;  %s766_s17 = sshll.u32 %s1191_s16, 2  ;;  %v1126_v18 = vld [vmem:[%s1188_s2] ss:$0 sm:$0xff] }
   0xd   : > { %982 = vmatpush3.bf16.msra.mxu0 %v1025_v0  ;;  %1016 = vmatpush3.bf16.msra.mxu1 %v1025_v0  ;;  %s1089_s20 = scalar_lea.vmem %s1186_s0, %s766_s17  ;;  %s1140_s25 = scalar_lea.vmem %s1189_s3, %s766_s17 }
   0xe   : > { %v1026_v1 = vld [vmem:[%s1089_s20] sm:$0xff]   ;;  %v1028_v3 = vld [vmem:[%s1089_s20 + $0x8] sm:$0xff]   ;;  %v1030_v5 = vld [vmem:[%s1089_s20 + $0x10] sm:$0xff]  }
   0xf   : > { %v1027_v2 = vld [vmem:[%s1089_s20 + $0x40] sm:$0xff]   ;;  %983 = vmatprep.mubr.msk.bf16.mxu0 %vm302_vm0, %v1026_v1  ;;  %v1029_v4 = vld [vmem:[%s1089_s20 + $0x48] sm:$0xff]   ;;  %v1031_v6 = vld [vmem:[%s1089_s20 + $0x50] sm:$0xff]  }
  0x10   : > { %999 = vmatprep.mubr.msk.bf16.mxu1 %vm302_vm0, %v1027_v2  ;;  %984 = vmatmul.mubr.msk.bf16.vlgmr.msra.gmra.mxu0 %vm302_vm0, %v1028_v3  ;;  %v1032_v7 = vld [vmem:[%s1089_s20 + $0x18] sm:$0xff]   ;;  %v1034_v9 = vld [vmem:[%s1089_s20 + $0x20] sm:$0xff]   ;;  %v1036_v11 = vld [vmem:[%s1089_s20 + $0x28] sm:$0xff]  }
  0x11   : > { %1000 = vmatmul.mubr.msk.bf16.vlgmr.msra.gmra.mxu1 %vm302_vm0, %v1029_v4  ;;  %987 = vmatprep.mubr.msk.bf16.mxu0 %vm302_vm0, %v1030_v5  ;;  %v1033_v8 = vld [vmem:[%s1089_s20 + $0x58] sm:$0xff]   ;;  %v1035_v10 = vld [vmem:[%s1089_s20 + $0x60] sm:$0xff]   ;;  %v1037_v12 = vld [vmem:[%s1089_s20 + $0x68] sm:$0xff]  }
  0x12   : > { %1003 = vmatprep.mubr.msk.bf16.mxu1 %vm302_vm0, %v1031_v6  ;;  %v1038_v13 = vld [vmem:[%s1089_s20 + $0x30] sm:$0xff]   ;;  %v1040_v15 = vld [vmem:[%s1089_s20 + $0x38] sm:$0xff]  }
  0x13   : > { %v1039_v14 = vld [vmem:[%s1089_s20 + $0x70] sm:$0xff]   ;;  %v1041_v16 = vld [vmem:[%s1089_s20 + $0x78] sm:$0xff]  }
  0x18   : > { %988 = vmatmul.mubr.msk.bf16.gmra.mxu0 %vm302_vm0, %v1032_v7 }
  0x19   : > { %1004 = vmatmul.mubr.msk.bf16.gmra.mxu1 %vm302_vm0, %v1033_v8  ;;  %991 = vmatprep.mubr.msk.bf16.mxu0 %vm302_vm0, %v1034_v9 }
  0x1a   : > { %1007 = vmatprep.mubr.msk.bf16.mxu1 %vm302_vm0, %v1035_v10 }
  0x20   : > { %992 = vmatmul.mubr.msk.bf16.gmra.mxu0 %vm302_vm0, %v1036_v11 }
  0x21   : > { %1008 = vmatmul.mubr.msk.bf16.gmra.mxu1 %vm302_vm0, %v1037_v12  ;;  %995 = vmatprep.mubr.msk.bf16.mxu0 %vm302_vm0, %v1038_v13 }
  0x22   : > { %1011 = vmatprep.mubr.msk.bf16.mxu1 %vm302_vm0, %v1039_v14 }
  0x28   : > { %996 = vmatmul.mubr.msk.bf16.gmra.mxu0 %vm302_vm0, %v1040_v15 }
  0x29   : > { %1012 = vmatmul.mubr.msk.bf16.gmra.mxu1 %vm302_vm0, %v1041_v16 }
  0xd0   : > { %v985_v17 = vpop.f32.mrf.mxu0 }
  0xd1   : > { %v1001_v19 = vpop.f32.mrf.mxu1  ;;  %v394_v21 = vadd.f32 %v985_v17, %v1126_v18 }
  0xd2   : > { %v385_v20 = vpop.f32.mrf.mxu0  ;;  %v458_v23 = vadd.f32 %v1001_v19, %v1126_v18 }
  0xd3   : > { %v449_v22 = vpop.f32.mrf.mxu1  ;;  %v386_v25 = vadd.f32 %v1126_v18, %v385_v20  ;;  %v514_v31 = vmax.f32 %v394_v21, 0.0 }
  0xd4   : > { %v986_v24 = vpop.f32.mrf.mxu0  ;;  %v450_v28 = vadd.f32 %v1126_v18, %v449_v22  ;;  %v530_v35 = vmax.f32 %v458_v23, 0.0 }
  0xd5   : > { %v397_v26 = vadd.f32 %v986_v24, %v1126_v18  ;;  %v1002_v27 = vpop.f32.mrf.mxu1  ;;  %v512_v39 = vmax.f32 %v386_v25, 0.0 }
  0xd6   : > { %v461_v29 = vadd.f32 %v1002_v27, %v1126_v18  ;;  %v388_v30 = vpop.f32.mrf.mxu0  ;;  %v528_v43 = vmax.f32 %v450_v28, 0.0 }
  0xd7   : > { %v515_v32 = vmax.f32 %v397_v26, 0.0  ;;  %v389_v33 = vadd.f32 %v1126_v18, %v388_v30  ;;  %v452_v34 = vpop.f32.mrf.mxu1 }
  0xd8   : > { %v531_v36 = vmax.f32 %v461_v29, 0.0  ;;  %v453_v37 = vadd.f32 %v1126_v18, %v452_v34  ;;  %v989_v38 = vpop.f32.mrf.mxu0 }
  0xd9   : > { %v877_v40 = vpack.c.bf16 %v515_v32, %v514_v31  ;;  %v513_v41 = vmax.f32 %v389_v33, 0.0  ;;  %v1005_v42 = vpop.f32.mrf.mxu1  ;;  %v410_v48 = vadd.f32 %v989_v38, %v1126_v18 }
  0xda   : > { %v917_v44 = vpack.c.bf16 %v531_v36, %v530_v35  ;;  %v529_v45 = vmax.f32 %v453_v37, 0.0  ;;  %v401_v46 = vpop.f32.mrf.mxu0  ;;  %v474_v51 = vadd.f32 %v1005_v42, %v1126_v18 }
  0xdb   : > { %949 = vst [vmem:[%s1140_s25 + $0x8] sm:$0xff] %v877_v40   ;;  %v872_v47 = vpack.c.bf16 %v513_v41, %v512_v39  ;;  %v465_v49 = vpop.f32.mrf.mxu1  ;;  %v402_v53 = vadd.f32 %v1126_v18, %v401_v46  ;;  %v518_v59 = vmax.f32 %v410_v48, 0.0 }
  0xdc   : > { %957 = vst [vmem:[%s1140_s25 + $0x48] sm:$0xff] %v917_v44   ;;  %v912_v50 = vpack.c.bf16 %v529_v45, %v528_v43  ;;  %v990_v52 = vpop.f32.mrf.mxu0  ;;  %v466_v56 = vadd.f32 %v1126_v18, %v465_v49  ;;  %v534_v63 = vmax.f32 %v474_v51, 0.0 }
  0xdd   : > { %873 = vst [vmem:[%s1140_s25] sm:$0xff] %v872_v47   ;;  %v413_v54 = vadd.f32 %v990_v52, %v1126_v18  ;;  %v1006_v55 = vpop.f32.mrf.mxu1  ;;  %v516_v3 = vmax.f32 %v402_v53, 0.0 }
  0xde   : > { %956 = vst [vmem:[%s1140_s25 + $0x40] sm:$0xff] %v912_v50   ;;  %v477_v57 = vadd.f32 %v1006_v55, %v1126_v18  ;;  %v404_v58 = vpop.f32.mrf.mxu0  ;;  %v532_v7 = vmax.f32 %v466_v56, 0.0 }
  0xdf   : > { %v519_v60 = vmax.f32 %v413_v54, 0.0  ;;  %v405_v61 = vadd.f32 %v1126_v18, %v404_v58  ;;  %v468_v62 = vpop.f32.mrf.mxu1 }
  0xe0   : > { %v535_v0 = vmax.f32 %v477_v57, 0.0  ;;  %v469_v1 = vadd.f32 %v1126_v18, %v468_v62  ;;  %v993_v2 = vpop.f32.mrf.mxu0 }
  0xe1   : > { %v887_v4 = vpack.c.bf16 %v519_v60, %v518_v59  ;;  %v517_v5 = vmax.f32 %v405_v61, 0.0  ;;  %v1009_v6 = vpop.f32.mrf.mxu1  ;;  %v426_v12 = vadd.f32 %v993_v2, %v1126_v18 }
  0xe2   : > { %v927_v8 = vpack.c.bf16 %v535_v0, %v534_v63  ;;  %v533_v9 = vmax.f32 %v469_v1, 0.0  ;;  %v417_v10 = vpop.f32.mrf.mxu0  ;;  %v490_v15 = vadd.f32 %v1009_v6, %v1126_v18 }
  0xe3   : > { %951 = vst [vmem:[%s1140_s25 + $0x18] sm:$0xff] %v887_v4   ;;  %v882_v11 = vpack.c.bf16 %v517_v5, %v516_v3  ;;  %v481_v13 = vpop.f32.mrf.mxu1  ;;  %v418_v17 = vadd.f32 %v1126_v18, %v417_v10  ;;  %v522_v24 = vmax.f32 %v426_v12, 0.0 }
  0xe4   : > { %959 = vst [vmem:[%s1140_s25 + $0x58] sm:$0xff] %v927_v8   ;;  %v922_v14 = vpack.c.bf16 %v533_v9, %v532_v7  ;;  %v994_v16 = vpop.f32.mrf.mxu0  ;;  %v482_v21 = vadd.f32 %v1126_v18, %v481_v13  ;;  %v538_v28 = vmax.f32 %v490_v15, 0.0 }
  0xe5   : > { %950 = vst [vmem:[%s1140_s25 + $0x10] sm:$0xff] %v882_v11   ;;  %v429_v19 = vadd.f32 %v994_v16, %v1126_v18  ;;  %v1010_v20 = vpop.f32.mrf.mxu1  ;;  %v520_v32 = vmax.f32 %v418_v17, 0.0 }
  0xe6   : > { %958 = vst [vmem:[%s1140_s25 + $0x50] sm:$0xff] %v922_v14   ;;  %v493_v22 = vadd.f32 %v1010_v20, %v1126_v18  ;;  %v420_v23 = vpop.f32.mrf.mxu0  ;;  %v536_v36 = vmax.f32 %v482_v21, 0.0 }
  0xe7   : > { %v523_v25 = vmax.f32 %v429_v19, 0.0  ;;  %v421_v26 = vadd.f32 %v1126_v18, %v420_v23  ;;  %v484_v27 = vpop.f32.mrf.mxu1 }
  0xe8   : > { %v539_v29 = vmax.f32 %v493_v22, 0.0  ;;  %v485_v30 = vadd.f32 %v1126_v18, %v484_v27  ;;  %v997_v31 = vpop.f32.mrf.mxu0 }
  0xe9   : > { %v897_v33 = vpack.c.bf16 %v523_v25, %v522_v24  ;;  %v521_v34 = vmax.f32 %v421_v26, 0.0  ;;  %v1013_v35 = vpop.f32.mrf.mxu1  ;;  %v442_v41 = vadd.f32 %v997_v31, %v1126_v18 }
  0xea   : > { %v937_v37 = vpack.c.bf16 %v539_v29, %v538_v28  ;;  %v537_v38 = vmax.f32 %v485_v30, 0.0  ;;  %v433_v39 = vpop.f32.mrf.mxu0  ;;  %v506_v44 = vadd.f32 %v1013_v35, %v1126_v18 }
  0xeb   : > { %953 = vst [vmem:[%s1140_s25 + $0x28] sm:$0xff] %v897_v33   ;;  %v892_v40 = vpack.c.bf16 %v521_v34, %v520_v32  ;;  %v497_v42 = vpop.f32.mrf.mxu1  ;;  %v434_v46 = vadd.f32 %v1126_v18, %v433_v39  ;;  %v526_v52 = vmax.f32 %v442_v41, 0.0 }
  0xec   : > { %961 = vst [vmem:[%s1140_s25 + $0x68] sm:$0xff] %v937_v37   ;;  %v932_v43 = vpack.c.bf16 %v537_v38, %v536_v36  ;;  %v998_v45 = vpop.f32.mrf.mxu0  ;;  %v498_v49 = vadd.f32 %v1126_v18, %v497_v42  ;;  %v542_v56 = vmax.f32 %v506_v44, 0.0 }
  0xed   : > { %952 = vst [vmem:[%s1140_s25 + $0x20] sm:$0xff] %v892_v40   ;;  %v445_v47 = vadd.f32 %v998_v45, %v1126_v18  ;;  %v1014_v48 = vpop.f32.mrf.mxu1  ;;  %v524_v59 = vmax.f32 %v434_v46, 0.0 }
  0xee   : > { %960 = vst [vmem:[%s1140_s25 + $0x60] sm:$0xff] %v932_v43   ;;  %v509_v50 = vadd.f32 %v1014_v48, %v1126_v18  ;;  %v436_v51 = vpop.f32.mrf.mxu0  ;;  %v540_v62 = vmax.f32 %v498_v49, 0.0 }
  0xef   : > { %v527_v53 = vmax.f32 %v445_v47, 0.0  ;;  %v437_v54 = vadd.f32 %v1126_v18, %v436_v51  ;;  %v500_v55 = vpop.f32.mrf.mxu1 }
  0xf0   : > { %v543_v57 = vmax.f32 %v509_v50, 0.0  ;;  %v501_v58 = vadd.f32 %v1126_v18, %v500_v55 }
  0xf1   : > { %v907_v60 = vpack.c.bf16 %v527_v53, %v526_v52  ;;  %v525_v61 = vmax.f32 %v437_v54, 0.0 }
  0xf2   : > { %v947_v63 = vpack.c.bf16 %v543_v57, %v542_v56  ;;  %v541_v0 = vmax.f32 %v501_v58, 0.0 }
  0xf3   : > { %955 = vst [vmem:[%s1140_s25 + $0x38] sm:$0xff] %v907_v60   ;;  %v902_v1 = vpack.c.bf16 %v525_v61, %v524_v59 }
  0xf4   : > { %963 = vst [vmem:[%s1140_s25 + $0x78] sm:$0xff] %v947_v63   ;;  %v942_v2 = vpack.c.bf16 %v541_v0, %v540_v62 }
  0xf5   : > { %954 = vst [vmem:[%s1140_s25 + $0x30] sm:$0xff] %v902_v1  }
  0xf6   : > { %962 = vst [vmem:[%s1140_s25 + $0x70] sm:$0xff] %v942_v2  }
  0xf7 PF: > { %s13_s12 = sadd.s32 1, %s1048_s12  }
  0xf8   : > { %p10_p4 = scmp.ge.s32.totalorder %s13_s12, 4  }
  0xfa   :  { %12 = sbr.rel (!%p10_p4) target bundleno = 1 (0x1), region = 62 }

// kernel: resnet_forward.7
= control target key start
LH: loop header
LB: loop body
LE: loop exit
PB: predicated region body
PF: predicated region fallthrough
CT: control target
= control target key end

     0   :  { %s977_s15 = smov 0   ;;  %s979_s16 = smov 0   ;;  %s1099_s0 = inlined_call_operand.vmem [shape: bf16[2,8,4,256], index: 0, kind: input, shape index: {}]   ;;  %s1100_s1 = inlined_call_operand.vmem [shape: bf16[3,384,128], index: 1, kind: input, shape index: {}]   ;;  %s1101_s2 = inlined_call_operand.vmem [shape: f32[1,128], index: 2, kind: input, shape index: {}]   ;;  %s1102_s3 = inlined_call_operand.vmem [shape: f32[1,128], index: 3, kind: input, shape index: {}]   ;;  %s1103_s4 = inlined_call_operand.vmem [shape: bf16[2,4,4,128], index: 4, kind: output, shape index: {}]  }
   0x1   :  { %s981_s17 = smov 0   ;;  %s983_s18 = smov 0  }
   0x2   :  { %s985_s19 = smov 0   ;;  %s987_s20 = smov 0  }
   0x3   :  { %s989_s21 = smov 0  }
   0x4 LB: > { %s26_s22 = sadd.s32 1, %s935_s18  ;;  %s29_s23 = sadd.s32 1, %s939_s19  ;;  %s947_s21 = sphi %s989_s21, %s14_s21   ;;  %s943_s20 = sphi %s987_s20, %s1109_s20   ;;  %s939_s19 = sphi %s985_s19, %s1108_s19   ;;  %s935_s18 = sphi %s983_s18, %s1107_s18   ;;  %s931_s17 = sphi %s981_s17, %s1106_s17   ;;  %s927_s16 = sphi %s979_s16, %s1105_s16   ;;  %s923_s15 = sphi %s977_s15, %s1104_s15  }
   0x5   : > { %p27_p0 = scmp.ge.s32.totalorder %s26_s22, 3  ;;  %p705_p1 = scmp.ge.s32.totalorder %s947_s21, 1 }
   0x6   : > { %p209_p2 = scmp.lt.s32.totalorder %s947_s21, 25  ;;  %s33_s24 = sadd.s32 1, %s943_s20 }
   0x7   : > { %s1111_s22 = smov (%p27_p0, %s26_s22), 0  ;;  %s1113_s23 = smov (!%p27_p0, %s29_s23), %s939_s19 }
   0x8   : > { %p210_p3 = pnand %p705_p1, %p209_p2  ;;  %p31_p4 = scmp.ge.s32.totalorder %s1113_s23, 4 }
   0x9   : > { %s706_s25 = sshll.u32 (!%p210_p3), %s927_s16, 1  ;;  %p252_p6 = scmp.lt.s32.totalorder (!%p210_p3), %s931_s17, 1 }
   0xa   : > { %s1115_s23 = smov (%p31_p4, %s1113_s23), 0  ;;  %s1117_s24 = smov (!%p31_p4, %s33_s24), %s943_s20 }
   0xb   : > { %p35_p5 = scmp.ge.s32.totalorder %s1117_s24, 2  ;;  %213 = sbr.rel (%p210_p3) target bundleno = 287 (0x11f), region = 36 }
   0xc   : > { %s248_s26 = sadd.s32 (!%p210_p3), %s923_s15, %s706_s25  ;;  %p268_p7 = scmp.lt.s32.totalorder (!%p210_p3), %s927_s16, 3 }
   0xd   : > { %s1119_s24 = smov (%p35_p5, %s1117_s24), 0  ;;  %s707_s27 = sadd.s32 (!%p210_p3), 4294967295, %s248_s26 }
   0xe   : > { %p275_p8 = scmp.eq.s32.totalorder (!%p210_p3), %s923_s15, 0  ;;  %p250_p9 = scmp.gt.s32.totalorder (!%p210_p3), %s707_s27, 0 }
   0xf   : > { %p708_p10 = scmp.lt.s32.totalorder (!%p210_p3), %s707_s27, 7  ;;  %p718_p11 = scmp.ne.s32.totalorder (!%p210_p3), %s923_s15, 0 }
  0x10   : > { %s1121_s17 = smov (!%p252_p6, %s931_s17), 1  ;;  %s1123_s27 = smov (!%p250_p9, %s707_s27), 0 }
  0x11   : > { %s714_s28 = sshll.u32 %s1121_s17, 4  ;;  %s716_s29 = sshll.u32 %s1121_s17, 2 }
  0x12   : > { %s1125_s27 = smov (!%p708_p10, %s1123_s27), 7 }
  0x13   : > { %s269_s30 = scalar_select %p268_p7, %s927_s16, 3 }
  0x14   : > { %s713_s5 = sshll.u32 %s1125_s27, 1  ;;  %278 = sbr.rel (%p718_p11) target bundleno = 27 (0x1b), region = 40 }
  0x15   : > { %s258_s6 = sadd.s32 %s714_s28, %s713_s5  ;;  %s271_s7 = sadd.s32 %s716_s29, %s269_s30 }
  0x16   : > { %s715_s8 = sshll.u32 %s258_s6, 1  ;;  %s717_s9 = sshll.u32 %s271_s7, 1 }
  0x17   : > { %s260_s12 = scalar_lea.vmem %s1099_s0, %s715_s8  ;;  %s1034_s25 = scalar_lea.vmem %s1103_s4, %s717_s9 }
  0x19   : > { %v949_v0 = vmov 0.0  }
  0x1a   : > { %279 = vst [vmem:[#allocation2] sm:$0xf] %v949_v0 }
  0x1b PF: > { %p280_p12 = scmp.eq.s32.totalorder %s927_s16, 0 }
  0x1d   : > { %p281_p13 = pnand %p280_p12, %p275_p8 }
  0x1e   : > { %s757_s17 = smul.u32 (%p281_p13), 192, %s923_s15  ;;  %v286_v1 = vld [vmem:[%s260_s12] sm:$0xf] (%p281_p13)  ;;  %v950_v2 = vmov (%p281_p13), 0.0   ;;  %vm951_vm0 = vmmov (%p281_p13), 0   ;;  %vm292_vm1 = vcmask (%p281_p13), 1040384  }
  0x1f   : > { %285 = sbr.rel (!%p281_p13) target bundleno = 269 (0x10d), region = 44  ;;  %789 = vmatprep.subr.bf16.mxu1 (%p281_p13), %v950_v2  ;;  %805 = vmatprep.mubr.msk.bf16.mxu1 (%p281_p13), %vm951_vm0, %v950_v2  ;;  %v719_v3 = vcombine.low (%p281_p13), %v286_v1, %v286_v1  ;;  %v287_v21 = vunpack.c.l.bf16 (%p281_p13), %v286_v1  ;;  %vm745_vm2 = vmneg (%p281_p13), %vm292_vm1 }
  0x20   : > { %s1044_s28 = scalar_lea.vmem (%p281_p13), %s1100_s1, %s757_s17  ;;  %vm747_vm3 = vmpackc.low (%p281_p13), %vm745_vm2, %vm745_vm2 }
  0x21   : > { %v868_v4 = vld [vmem:[%s1044_s28 + $0x78] sm:$0xff] (%p281_p13)   ;;  %526 = vmatprep.mubr.bf16.mxu0 (%p281_p13), %v719_v3  ;;  %v871_v7 = vld [vmem:[%s1044_s28 + $0x70] sm:$0xff] (%p281_p13)   ;;  %v874_v10 = vld [vmem:[%s1044_s28 + $0x68] sm:$0xff] (%p281_p13)   ;;  %v289_v25 = vcombine.high (%p281_p13), %v287_v21, %v287_v21 }
  0x22   : > { %v869_v5 = vld [vmem:[%s1044_s28 + $0xb8] sm:$0xff] (%p281_p13)   ;;  %758 = vmatprep.subr.bf16.mxu0 (%p281_p13), %v868_v4  ;;  %v872_v8 = vld [vmem:[%s1044_s28 + $0xb0] sm:$0xff] (%p281_p13)   ;;  %v875_v11 = vld [vmem:[%s1044_s28 + $0xa8] sm:$0xff] (%p281_p13)  }
  0x23   : > { %v870_v6 = vld [vmem:[%s1044_s28 + $0x38] sm:$0xff] (%p281_p13)   ;;  %790 = vmatpush3.bf16.msra.mxu1 (%p281_p13), %v869_v5  ;;  %v873_v9 = vld [vmem:[%s1044_s28 + $0x30] sm:$0xff] (%p281_p13)   ;;  %v876_v12 = vld [vmem:[%s1044_s28 + $0x28] sm:$0xff] (%p281_p13)   ;;  %v290_v29 = vrot.slane (%p281_p13), %v289_v25, 7  ;;  %v297_v31 = vpack.c.bf16 (%p281_p13), %v289_v25, %v289_v25 }
  0x24   : > { %759 = vmatpush3.bf16.msra.mxu0 %v870_v6  ;;  %791 = vmatprep.subr.bf16.mxu1 %v950_v2  ;;  %v877_v13 = vld [vmem:[%s1044_s28 + $0x60] sm:$0xff]   ;;  %v880_v16 = vld [vmem:[%s1044_s28 + $0x58] sm:$0xff]   ;;  %v883_v19 = vld [vmem:[%s1044_s28 + $0x50] sm:$0xff]  }
  0x25   : > { %760 = vmatprep.subr.bf16.mxu0 %v871_v7  ;;  %v878_v14 = vld [vmem:[%s1044_s28 + $0xa0] sm:$0xff]   ;;  %v881_v17 = vld [vmem:[%s1044_s28 + $0x98] sm:$0xff]   ;;  %v884_v20 = vld [vmem:[%s1044_s28 + $0x90] sm:$0xff]   ;;  %v748_v32 = vpack.c.bf16 %v290_v29, %v290_v29 }
  0x26   : > { %v879_v15 = vld [vmem:[%s1044_s28 + $0x20] sm:$0xff]   ;;  %v882_v18 = vld [vmem:[%s1044_s28 + $0x18] sm:$0xff]   ;;  %v885_v22 = vld [vmem:[%s1044_s28 + $0x10] sm:$0xff]  }
  0x27   : > { %792 = vmatpush3.bf16.msra.mxu1 %v872_v8  ;;  %v886_v23 = vld [vmem:[%s1044_s28 + $0x48] sm:$0xff]   ;;  %v889_v27 = vld [vmem:[%s1044_s28 + $0x40] sm:$0xff]  }
  0x28   : > { %761 = vmatpush3.bf16.msra.mxu0 %v873_v9  ;;  %793 = vmatprep.subr.bf16.mxu1 %v950_v2  ;;  %v887_v24 = vld [vmem:[%s1044_s28 + $0x88] sm:$0xff]   ;;  %v890_v28 = vld [vmem:[%s1044_s28 + $0x80] sm:$0xff]  }
  0x29   : > { %762 = vmatprep.subr.bf16.mxu0 %v874_v10  ;;  %v888_v26 = vld [vmem:[%s1044_s28 + $0x8] sm:$0xff]   ;;  %v891_v30 = vld [vmem:[%s1044_s28] sm:$0xff]  }
  0x2a   : > { %v298_v39 = vld [vmem:[#allocation2] sm:$0xf] }
  0x2b   : > { %794 = vmatpush3.bf16.msra.mxu1 %v875_v11 }
  0x2c   : > { %763 = vmatpush3.bf16.msra.mxu0 %v876_v12  ;;  %795 = vmatprep.subr.bf16.mxu1 %v950_v2 }
  0x2d   : > { %764 = vmatprep.subr.bf16.mxu0 %v877_v13 }
  0x2f   : > { %796 = vmatpush3.bf16.msra.mxu1 %v878_v14 }
  0x30   : > { %765 = vmatpush3.bf16.msra.mxu0 %v879_v15  ;;  %797 = vmatprep.subr.bf16.mxu1 %v950_v2 }
  0x31   : > { %766 = vmatprep.subr.bf16.mxu0 %v880_v16 }
  0x33   : > { %798 = vmatpush3.bf16.msra.mxu1 %v881_v17 }
  0x34   : > { %767 = vmatpush3.bf16.msra.mxu0 %v882_v18  ;;  %799 = vmatprep.subr.bf16.mxu1 %v950_v2 }
  0x35   : > { %768 = vmatprep.subr.bf16.mxu0 %v883_v19 }
  0x37   : > { %800 = vmatpush3.bf16.msra.mxu1 %v884_v20 }
  0x38   : > { %769 = vmatpush3.bf16.msra.mxu0 %v885_v22  ;;  %801 = vmatprep.subr.bf16.mxu1 %v950_v2 }
  0x39   : > { %770 = vmatprep.subr.bf16.mxu0 %v886_v23 }
  0x3b   : > { %802 = vmatpush3.bf16.msra.mxu1 %v887_v24 }
  0x3c   : > { %771 = vmatpush3.bf16.msra.mxu0 %v888_v26  ;;  %803 = vmatprep.subr.bf16.mxu1 %v950_v2 }
  0x3d   : > { %772 = vmatprep.subr.bf16.mxu0 %v889_v27 }
  0x3f   : > { %804 = vmatpush3.bf16.msra.mxu1 %v890_v28 }
  0x40   : > { %773 = vmatpush3.bf16.msra.mxu0 %v891_v30 }
  0x42   : > { %806 = vmatmul.mubr.bf16.vlgmr.msra.gmra.mxu1 %v297_v31 }
  0x43   : > { %749 = vmatmul.mubr.msk.bf16.vlgmr.msra.gmra.mxu0 %vm747_vm3, %v748_v32 }
 0x102   : > { %v568_v33 = vpop.f32.mrf.mxu1 }
 0x103   : > { %v774_v34 = vpop.f32.mrf.mxu0 }
 0x104   : > { %v807_v35 = vpop.f32.mrf.mxu1 }
 0x105   : > { %v775_v36 = vpop.f32.mrf.mxu0 }
 0x106   : > { %v776_v37 = vadd.f32 %v775_v36, %v774_v34  ;;  %v571_v38 = vpop.f32.mrf.mxu1 }
 0x107   : > { %v777_v40 = vpop.f32.mrf.mxu0 }
 0x108   : > { %v569_v41 = vadd.f32 %v776_v37, %v568_v33  ;;  %v808_v42 = vpop.f32.mrf.mxu1 }
 0x109   : > { %v778_v43 = vpop.f32.mrf.mxu0 }
 0x10a   : > { %v574_v44 = vadd.f32 %v569_v41, %v298_v39 }
 0x10c   : > { %575 = vst [vmem:[#allocation2] sm:$0xf] %v574_v44 }
 0x10d PF: > { %p750_p0 = scmp.ne.s32.totalorder %s923_s15, 2 }
 0x10f   : > { %579 = sbr.rel (%p750_p0) target bundleno = 287 (0x11f), region = 48 }
 0x114   : > { %v580_v45 = vld [vmem:[#allocation2] sm:$0xf] }
 0x115   : > { %v751_v46 = vld [vmem:[%s1101_s2] ss:$0 sm:$0xff] }
 0x116   : > { %v752_v47 = vld [vmem:[%s1102_s3] ss:$0 sm:$0xff]  ;;  %v588_v48 = vmul.f32 %v751_v46, %v580_v45 }
 0x118   : > { %v596_v49 = vadd.f32 %v752_v47, %v588_v48 }
 0x11a   : > { %v597_v50 = vmax.f32 %v596_v49, 0.0 }
 0x11c   : > { %v598_v51 = vpack.c.bf16 %v597_v50, %v597_v50 }
 0x11e   : > { %599 = vst [vmem:[%s1034_s25] sm:$0x3] %v598_v51 }
 0x11f PF: > { %s14_s21 = sadd.s32 1, %s947_s21   ;;  %s1104_s15 = smov %s935_s18 }
 0x120   : > { %p11_p1 = scmp.ge.s32.totalorder %s14_s21, 26   ;;  %s1105_s16 = smov %s939_s19 }
 0x121   : > { %s1106_s17 = smov %s943_s20  ;;  %s1107_s18 = smov %s1111_s22 }
 0x122   : > { %s1108_s19 = smov %s1115_s23  ;;  %s1109_s20 = smov %s1119_s24 }
 0x123   :  { %13 = sbr.rel (!%p11_p1) target bundleno = 4 (0x4), region = 79 }

// kernel: resnet_forward.8
= control target key start
LH: loop header
LB: loop body
LE: loop exit
PB: predicated region body
PF: predicated region fallthrough
CT: control target
= control target key end

     0   :  { %s1261_s21 = smov 0   ;;  %s1263_s22 = smov 0   ;;  %s1422_s0 = inlined_call_operand.vmem [shape: bf16[2,4,4,128], index: 0, kind: input, shape index: {}]   ;;  %s1423_s1 = inlined_call_operand.vmem [shape: bf16[2,8,4,256], index: 1, kind: input, shape index: {}]   ;;  %s1424_s2 = inlined_call_operand.vmem [shape: bf16[3,384,128], index: 2, kind: input, shape index: {}]   ;;  %s1425_s3 = inlined_call_operand.vmem [shape: bf16[128,128], index: 3, kind: input, shape index: {}]   ;;  %s1426_s4 = inlined_call_operand.vmem [shape: f32[1,128], index: 4, kind: input, shape index: {}]   ;;  %s1427_s5 = inlined_call_operand.vmem [shape: f32[1,128], index: 5, kind: input, shape index: {}]   ;;  %s1428_s6 = inlined_call_operand.vmem [shape: f32[2,1,128], index: 6, kind: output, shape index: {}]  }
   0x1   :  { %s1265_s23 = smov 0   ;;  %s1267_s24 = smov 0  }
   0x2   :  { %s1269_s25 = smov 0   ;;  %s1271_s26 = smov 0  }
   0x3   :  { %s1273_s27 = smov 0  }
   0x4 LB: > { %1430 = sst [smem:[#allocation3_spill]] %s1215_s26  ;;  %s28_s28 = sadd.s32 1, %s1207_s24  ;;  %s1219_s27 = sphi %s1273_s27, %s16_s27   ;;  %s1215_s26 = sphi %s1271_s26, %s1437_s26   ;;  %s1211_s25 = sphi %s1269_s25, %s1441_s25   ;;  %s1207_s24 = sphi %s1267_s24, %s1440_s24   ;;  %s1203_s23 = sphi %s1265_s23, %s1434_s23   ;;  %s1199_s22 = sphi %s1263_s22, %s1439_s22   ;;  %s1195_s21 = sphi %s1261_s21, %s1438_s21  }
   0x5   : > { %p29_p0 = scmp.ge.s32.totalorder %s28_s28, 3  ;;  %s31_s29 = sadd.s32 1, %s1211_s25 }
   0x6   : > { %p922_p1 = scmp.ge.s32.totalorder %s1219_s27, 1  ;;  %p280_p2 = scmp.lt.s32.totalorder %s1219_s27, 25 }
   0x7   : > { %s1443_s28 = smov (%p29_p0, %s28_s28), 0  ;;  %s1445_s29 = smov (!%p29_p0, %s31_s29), %s1211_s25 }
   0x8   : > { %1431 = sst [smem:[#allocation4_spill]] %s1443_s28  ;;  %p281_p3 = pnand %p922_p1, %p280_p2 }
   0x9   : > { %p33_p4 = scmp.ge.s32.totalorder %s1445_s29, 4  ;;  %s35_s30 = sadd.s32 1, %s1215_s26 }
   0xa   : > { %s327_s7 = sadd.s32 (!%p281_p3), %s1195_s21, %s1199_s22  ;;  %p333_p6 = scmp.lt.s32.totalorder (!%p281_p3), %s1203_s23, 1 }
   0xb   : > { %s1447_s29 = smov (%p33_p4, %s1445_s29), 0  ;;  %s1449_s30 = smov (!%p33_p4, %s35_s30), %s1215_s26 }
   0xc   : > { %1432 = sst [smem:[#allocation5_spill]] %s1447_s29  ;;  %p37_p5 = scmp.ge.s32.totalorder %s1449_s30, 2 }
   0xd   : > { %284 = sbr.rel (%p281_p3) target bundleno = 548 (0x224), region = 44  ;;  %s1309_s8 = sadd.s32 (!%p281_p3), 4294967295, %s327_s7 }
   0xe   : > { %s1451_s30 = smov (%p37_p5, %s1449_s30), 0  ;;  %s931_s9 = sshll.u32 (!%p281_p3), %s1199_s22, 1 }
   0xf   : > { %1433 = sst [smem:[#allocation6_spill]] %s1451_s30  ;;  %p329_p7 = scmp.gt.s32.totalorder (!%p281_p3), %s1309_s8, 0 }
  0x10   : > { %p924_p8 = scmp.lt.s32.totalorder (!%p281_p3), %s1309_s8, 3  ;;  %p350_p9 = scmp.lt.s32.totalorder (!%p281_p3), %s931_s9, 7 }
  0x11   : > { %p362_p11 = scmp.eq.s32.totalorder (!%p281_p3), %s1199_s22, 0  ;;  %p363_p12 = scmp.eq.s32.totalorder (!%p281_p3), %s1195_s21, 0 }
  0x12   : > { %s1453_s23 = smov (!%p333_p6, %s1203_s23), 1  ;;  %s1457_s9 = smov (!%p350_p9, %s931_s9), 7 }
  0x13   : > { %s330_s10 = scalar_select %p329_p7, %s1309_s8, 0 }
  0x14   : > { %s929_s11 = sshll.u32 %s1453_s23, 2  ;;  %s933_s12 = sshll.u32 %s1453_s23, 4 }
  0x15   : > { %s1455_s10 = smov (!%p924_p8, %s330_s10), 3  ;;  %s932_s13 = sshll.u32 %s1457_s9, 1 }
  0x16   : > { %p335_p10 = scmp.lt.s32.totalorder %s1455_s10, 3  ;;  %s1318_s16 = scalar_lea.vmem %s1428_s6, %s1453_s23 }
  0x17   : > { %s354_s17 = sadd.s32 %s933_s12, %s932_s13  ;;  %p364_p13 = pnand %p363_p12, %p362_p11 }
  0x18   : > { %s1459_s10 = smov (!%p335_p10, %s1455_s10), 3  ;;  %s934_s19 = sshll.u32 %s354_s17, 1 }
  0x19   : > { %s338_s18 = sadd.s32 %s929_s11, %s1459_s10  ;;  %s1324_s29 = scalar_lea.vmem %s1423_s1, %s934_s19 }
  0x1a   : > { %s930_s20 = sshll.u32 %s338_s18, 1  ;;  %367 = sbr.rel (%p364_p13) target bundleno = 33 (0x21), region = 48 }
  0x1b   : > { %s1329_s9 = scalar_lea.vmem %s1422_s0, %s930_s20 }
  0x1f   : > { %v1221_v0 = vmov 0.0  }
  0x20   : > { %368 = vst [vmem:[%s1318_s16] sm:$0x1] %v1221_v0 }
  0x21 PF: > { %p935_p0 = scmp.ne.s32.totalorder %s1195_s21, 0 }
  0x23   : > { %371 = sbr.rel (%p935_p0) target bundleno = 272 (0x110), region = 52 }
  0x28   : > { %v1132_v1 = vld [vmem:[%s1425_s3 + $0x38] sm:$0xff]   ;;  %v1222_v2 = vmov 0.0   ;;  %v1133_v3 = vld [vmem:[%s1425_s3 + $0x30] sm:$0xff]   ;;  %vm1223_vm0 = vmmov 0   ;;  %v1134_v4 = vld [vmem:[%s1425_s3 + $0x28] sm:$0xff]  }
  0x29   : > { %1031 = vmatprep.subr.bf16.mxu0 %v1222_v2  ;;  %1047 = vmatprep.mubr.msk.bf16.mxu0 %vm1223_vm0, %v1222_v2  ;;  %v1135_v5 = vld [vmem:[%s1425_s3 + $0x20] sm:$0xff]   ;;  %v1136_v6 = vld [vmem:[%s1425_s3 + $0x18] sm:$0xff]   ;;  %v1137_v7 = vld [vmem:[%s1425_s3 + $0x10] sm:$0xff]  }
  0x2a   : > { %1032 = vmatpush3.bf16.msra.mxu0 %v1132_v1  ;;  %v1138_v8 = vld [vmem:[%s1425_s3 + $0x8] sm:$0xff]   ;;  %v1139_v9 = vld [vmem:[%s1425_s3] sm:$0xff]  }
  0x2b   : > { %1033 = vmatprep.subr.bf16.mxu0 %v1222_v2  ;;  %v372_v10 = vld [vmem:[%s1324_s29] sm:$0xf] }
  0x2e   : > { %1034 = vmatpush3.bf16.msra.mxu0 %v1133_v3 }
  0x2f   : > { %1035 = vmatprep.subr.bf16.mxu0 %v1222_v2 }
  0x32   : > { %1036 = vmatpush3.bf16.msra.mxu0 %v1134_v4 }
  0x33   : > { %1037 = vmatprep.subr.bf16.mxu0 %v1222_v2 }
  0x36   : > { %1038 = vmatpush3.bf16.msra.mxu0 %v1135_v5 }
  0x37   : > { %1039 = vmatprep.subr.bf16.mxu0 %v1222_v2 }
  0x3a   : > { %1040 = vmatpush3.bf16.msra.mxu0 %v1136_v6 }
  0x3b   : > { %1041 = vmatprep.subr.bf16.mxu0 %v1222_v2 }
  0x3e   : > { %1042 = vmatpush3.bf16.msra.mxu0 %v1137_v7 }
  0x3f   : > { %1043 = vmatprep.subr.bf16.mxu0 %v1222_v2 }
  0x42   : > { %1044 = vmatpush3.bf16.msra.mxu0 %v1138_v8 }
  0x43   : > { %1045 = vmatprep.subr.bf16.mxu0 %v1222_v2 }
  0x46   : > { %1046 = vmatpush3.bf16.msra.mxu0 %v1139_v9 }
  0x49   : > { %1048 = vmatmul.mubr.bf16.vlgmr.msra.gmra.mxu0 %v372_v10 }
 0x109   : > { %v471_v11 = vpop.f32.mrf.mxu0 }
 0x10a   : > { %477 = vst [vmem:[#allocation2] sm:$0xf] %v471_v11 }
 0x10b   : > { %v1049_v12 = vpop.f32.mrf.mxu0 }
 0x10d   : > { %v474_v13 = vpop.f32.mrf.mxu0 }
 0x10f   : > { %v1050_v14 = vpop.f32.mrf.mxu0 }
 0x110 PF: > { %p480_p1 = scmp.ge.s32.totalorder %s1309_s8, 0  ;;  %p481_p2 = scmp.le.s32.totalorder %s1309_s8, 3 }
 0x112   : > { %p482_p3 = pnand %p481_p2, %p480_p1 }
 0x113   : > { %s990_s22 = smul.u32 (!%p482_p3), 192, %s1195_s21 }
 0x114   : > { %485 = sbr.rel (%p482_p3) target bundleno = 517 (0x205), region = 56 }
 0x115   : > { %s1366_s26 = scalar_lea.vmem (!%p482_p3), %s1424_s2, %s990_s22 }
 0x119   : > { %v486_v15 = vld [vmem:[%s1329_s9] sm:$0x3]  ;;  %v1224_v16 = vmov 0.0   ;;  %vm1225_vm1 = vmmov 0   ;;  %v1140_v18 = vld [vmem:[%s1366_s26 + $0x78] sm:$0xff]   ;;  %v1143_v21 = vld [vmem:[%s1366_s26 + $0x70] sm:$0xff]  }
 0x11a   : > { %1051 = vmatprep.subr.bf16.mxu1 %v1224_v16  ;;  %1067 = vmatprep.mubr.msk.bf16.mxu1 %vm1225_vm1, %v1224_v16  ;;  %v945_v17 = vcombine.low %v486_v15, %v486_v15  ;;  %v1141_v19 = vld [vmem:[%s1366_s26 + $0xb8] sm:$0xff]   ;;  %v1144_v22 = vld [vmem:[%s1366_s26 + $0xb0] sm:$0xff]   ;;  %v1146_v24 = vld [vmem:[%s1366_s26 + $0x68] sm:$0xff]   ;;  %v487_v37 = vunpack.c.l.bf16 %v486_v15  ;;  %vm491_vm2 = vcmask 1040384   ;;  %vm495_vm3 = vcmask 1042432  }
 0x11b   : > { %1000 = vmatprep.subr.bf16.mxu0 %v1140_v18  ;;  %v1142_v20 = vld [vmem:[%s1366_s26 + $0x38] sm:$0xff]   ;;  %1052 = vmatpush3.bf16.msra.mxu1 %v1141_v19  ;;  %v1145_v23 = vld [vmem:[%s1366_s26 + $0x30] sm:$0xff]   ;;  %v1147_v25 = vld [vmem:[%s1366_s26 + $0xa8] sm:$0xff]  }
 0x11c   : > { %728 = vmatprep.mubr.bf16.mxu0 %v945_v17  ;;  %1001 = vmatpush3.bf16.msra.mxu0 %v1142_v20  ;;  %v1148_v26 = vld [vmem:[%s1366_s26 + $0x28] sm:$0xff]   ;;  %v1149_v27 = vld [vmem:[%s1366_s26 + $0x60] sm:$0xff]   ;;  %v1152_v30 = vld [vmem:[%s1366_s26 + $0x58] sm:$0xff]   ;;  %v493_v41 = vrot.slane %v487_v37, 1  ;;  %v489_v43 = vrot.slane %v487_v37, 7 }
 0x11d   : > { %1053 = vmatprep.subr.bf16.mxu1 %v1224_v16  ;;  %1002 = vmatprep.subr.bf16.mxu0 %v1143_v21  ;;  %v1150_v28 = vld [vmem:[%s1366_s26 + $0xa0] sm:$0xff]   ;;  %v1153_v31 = vld [vmem:[%s1366_s26 + $0x98] sm:$0xff]   ;;  %v1155_v33 = vld [vmem:[%s1366_s26 + $0x50] sm:$0xff]  }
 0x11e   : > { %v1151_v29 = vld [vmem:[%s1366_s26 + $0x20] sm:$0xff]   ;;  %v1154_v32 = vld [vmem:[%s1366_s26 + $0x18] sm:$0xff]   ;;  %v1156_v34 = vld [vmem:[%s1366_s26 + $0x90] sm:$0xff]   ;;  %v977_v45 = vpack.c.bf16 %v493_v41, %v493_v41  ;;  %v974_v46 = vpack.c.bf16 %v489_v43, %v489_v43 }
 0x11f   : > { %1054 = vmatpush3.bf16.msra.mxu1 %v1144_v22  ;;  %v1157_v35 = vld [vmem:[%s1366_s26 + $0x10] sm:$0xff]   ;;  %v1158_v36 = vld [vmem:[%s1366_s26 + $0x48] sm:$0xff]   ;;  %v1161_v40 = vld [vmem:[%s1366_s26 + $0x40] sm:$0xff]  }
 0x120   : > { %1003 = vmatpush3.bf16.msra.mxu0 %v1145_v23  ;;  %1055 = vmatprep.subr.bf16.mxu1 %v1224_v16  ;;  %v1159_v38 = vld [vmem:[%s1366_s26 + $0x88] sm:$0xff]   ;;  %v1162_v42 = vld [vmem:[%s1366_s26 + $0x80] sm:$0xff]   ;;  %vm971_vm4 = vmneg %vm491_vm2 }
 0x121   : > { %1004 = vmatprep.subr.bf16.mxu0 %v1146_v24  ;;  %v1160_v39 = vld [vmem:[%s1366_s26 + $0x8] sm:$0xff]   ;;  %v1163_v44 = vld [vmem:[%s1366_s26] sm:$0xff]   ;;  %vm976_vm5 = vmpackc.low %vm495_vm3, %vm495_vm3 }
 0x122   : > { %vm973_vm6 = vmpackc.low %vm971_vm4, %vm971_vm4  ;;  %v500_v53 = vld [vmem:[#allocation2] sm:$0xf] }
 0x123   : > { %1056 = vmatpush3.bf16.msra.mxu1 %v1147_v25 }
 0x124   : > { %1005 = vmatpush3.bf16.msra.mxu0 %v1148_v26  ;;  %1057 = vmatprep.subr.bf16.mxu1 %v1224_v16 }
 0x125   : > { %1006 = vmatprep.subr.bf16.mxu0 %v1149_v27 }
 0x127   : > { %1058 = vmatpush3.bf16.msra.mxu1 %v1150_v28 }
 0x128   : > { %1007 = vmatpush3.bf16.msra.mxu0 %v1151_v29  ;;  %1059 = vmatprep.subr.bf16.mxu1 %v1224_v16 }
 0x129   : > { %1008 = vmatprep.subr.bf16.mxu0 %v1152_v30 }
 0x12b   : > { %1060 = vmatpush3.bf16.msra.mxu1 %v1153_v31 }
 0x12c   : > { %1009 = vmatpush3.bf16.msra.mxu0 %v1154_v32  ;;  %1061 = vmatprep.subr.bf16.mxu1 %v1224_v16 }
 0x12d   : > { %1010 = vmatprep.subr.bf16.mxu0 %v1155_v33 }
 0x12f   : > { %1062 = vmatpush3.bf16.msra.mxu1 %v1156_v34 }
 0x130   : > { %1011 = vmatpush3.bf16.msra.mxu0 %v1157_v35  ;;  %1063 = vmatprep.subr.bf16.mxu1 %v1224_v16 }
 0x131   : > { %1012 = vmatprep.subr.bf16.mxu0 %v1158_v36 }
 0x133   : > { %1064 = vmatpush3.bf16.msra.mxu1 %v1159_v38 }
 0x134   : > { %1013 = vmatpush3.bf16.msra.mxu0 %v1160_v39  ;;  %1065 = vmatprep.subr.bf16.mxu1 %v1224_v16 }
 0x135   : > { %1014 = vmatprep.subr.bf16.mxu0 %v1161_v40 }
 0x137   : > { %1066 = vmatpush3.bf16.msra.mxu1 %v1162_v42 }
 0x138   : > { %1015 = vmatpush3.bf16.msra.mxu0 %v1163_v44 }
 0x13a   : > { %1068 = vmatmul.mubr.msk.bf16.vlgmr.msra.gmra.mxu1 %vm976_vm5, %v977_v45 }
 0x13b   : > { %975 = vmatmul.mubr.msk.bf16.vlgmr.msra.gmra.mxu0 %vm973_vm6, %v974_v46 }
 0x1fa   : > { %v770_v47 = vpop.f32.mrf.mxu1 }
 0x1fb   : > { %v1016_v48 = vpop.f32.mrf.mxu0 }
 0x1fc   : > { %v1069_v49 = vpop.f32.mrf.mxu1 }
 0x1fd   : > { %v1017_v50 = vpop.f32.mrf.mxu0 }
 0x1fe   : > { %v1018_v51 = vadd.f32 %v1017_v50, %v1016_v48  ;;  %v773_v52 = vpop.f32.mrf.mxu1 }
 0x1ff   : > { %v1019_v54 = vpop.f32.mrf.mxu0 }
 0x200   : > { %v771_v55 = vadd.f32 %v1018_v51, %v770_v47  ;;  %v1070_v56 = vpop.f32.mrf.mxu1 }
 0x201   : > { %v1020_v57 = vpop.f32.mrf.mxu0 }
 0x202   : > { %v776_v58 = vadd.f32 %v771_v55, %v500_v53 }
 0x204   : > { %777 = vst [vmem:[#allocation2] sm:$0xf] %v776_v58 }
 0x205 PF: > { %p979_p4 = scmp.ne.s32.totalorder %s1195_s21, 2 }
 0x207   : > { %781 = sbr.rel (%p979_p4) target bundleno = 548 (0x224), region = 60 }
 0x20c   : > { %v782_v59 = vld [vmem:[#allocation2] sm:$0xf]  ;;  %vm801_vm7 = vcmask 1043456  }
 0x20d   : > { %v980_v60 = vld [vmem:[%s1426_s4] ss:$0 sm:$0xff] }
 0x20e   : > { %v981_v61 = vld [vmem:[%s1427_s5] ss:$0 sm:$0xff]  ;;  %v790_v62 = vmul.f32 %v980_v60, %v782_v59 }
 0x20f   : > { %v800_v7 = vld [vmem:[%s1318_s16] sm:$0x1] }
 0x210   : > { %v798_v63 = vadd.f32 %v981_v61, %v790_v62 }
 0x212   : > { %v799_v0 = vmax.f32 %v798_v63, 0.0 }
 0x214   : > { %v802_v1 = vsel %vm801_vm7, %v799_v0, 0.0 }
 0x215   : > { %v803_v2 = vrot.slane %v802_v1, 4 }
 0x217   : > { %v804_v3 = vadd.f32 %v803_v2, %v802_v1 }
 0x219   : > { %v805_v4 = vrot.slane %v804_v3, 2 }
 0x21b   : > { %v806_v5 = vadd.f32 %v805_v4, %v804_v3 }
 0x21d   : > { %v807_v6 = vrot.slane %v806_v5, 1 }
 0x21f   : > { %v808_v8 = vadd.f32 %v807_v6, %v806_v5 }
 0x221   : > { %v809_v9 = vadd.f32 %v808_v8, %v800_v7 }
 0x223   : > { %810 = vst [vmem:[%s1318_s16] sm:$0x1] %v809_v9 }
 0x224 PF: > { %s16_s27 = sadd.s32 1, %s1219_s27   ;;  %s1434_s23 = sld [smem:[#allocation3_spill]] }
 0x225   : > { %p13_p5 = scmp.ge.s32.totalorder %s16_s27, 26   ;;  %s1435_s10 = sld [smem:[#allocation4_spill]] }
 0x226   : > { %s1436_s11 = sld [smem:[#allocation5_spill]]  ;;  %s1438_s21 = smov %s1207_s24 }
 0x227   : > { %s1437_s26 = sld [smem:[#allocation6_spill]]  ;;  %s1439_s22 = smov %s1211_s25 }
 0x228   :  { %15 = sbr.rel (!%p13_p5) target bundleno = 4 (0x4), region = 94 }
 0x22b   : > { %s1440_s24 = smov %s1435_s10 }
 0x22c   : > { %s1441_s25 = smov %s1436_s11 }

// kernel: resnet_forward.9
= control target key start
LH: loop header
LB: loop body
LE: loop exit
PB: predicated region body
PF: predicated region fallthrough
CT: control target
= control target key end

     0   :  { %v202_v1 = vmov 0.0   ;;  %vm203_vm0 = vmmov 0   ;;  %s282_s0 = inlined_call_operand.vmem [shape: f32[2,128], index: 0, kind: input, shape index: {}]   ;;  %s283_s1 = inlined_call_operand.vmem [shape: f32[128,128], index: 1, kind: input, shape index: {}]   ;;  %s284_s2 = inlined_call_operand.vmem [shape: f32[1,128], index: 2, kind: input, shape index: {}]   ;;  %s285_s3 = inlined_call_operand.hbm [shape: f32[2,128], index: 3, kind: output, shape index: {}]  }
   0x1   :  { %v31_v0 = vld [vmem:[%s283_s1 + $0x78] sm:$0xff]  ;;  %142 = vmatprep.subr.mxu0 %v202_v1  ;;  %v30_v2 = vld [vmem:[%s283_s1 + $0x70] sm:$0xff]  ;;  %174 = vmatprep.mubr.msk.f32.mxu0 %vm203_vm0, %v202_v1  ;;  %v29_v3 = vld [vmem:[%s283_s1 + $0x68] sm:$0xff] }
   0x2   :  { %143 = vmatpush3.msra.mxu0 %v31_v0  ;;  %v28_v4 = vld [vmem:[%s283_s1 + $0x60] sm:$0xff] }
   0x3   :  { %144 = vmatprep.subr.mxu0 %v202_v1 }
   0x4   :  { %145 = vmatpush3.msra.mxu0 %v30_v2 }
   0x5   :  { %146 = vmatprep.subr.mxu0 %v202_v1 }
   0x6   :  { %147 = vmatpush3.msra.mxu0 %v29_v3 }
   0x7   :  { %8 = vsyncpa [#allocation3], 0  ;;  %148 = vmatprep.subr.mxu0 %v202_v1  ;;  %v27_v5 = vld [vmem:[%s283_s1 + $0x58] sm:$0xff]  ;;  %v26_v6 = vld [vmem:[%s283_s1 + $0x50] sm:$0xff]  ;;  %s204_s21 = smov [#allocation2]  }
   0x8   :  { %149 = vmatpush3.msra.mxu0 %v28_v4  ;;  %v25_v7 = vld [vmem:[%s283_s1 + $0x48] sm:$0xff]  ;;  %v24_v8 = vld [vmem:[%s283_s1 + $0x40] sm:$0xff]  ;;  %v23_v9 = vld [vmem:[%s283_s1 + $0x38] sm:$0xff]  ;;  %s116_s22 = sshll.u32 %s204_s21, 4  ;;  %s117_s22 = int_to_ptr.vmem [resolvable:$true] %s116_s22 }
   0x9   :  { %150 = vmatprep.subr.mxu0 %v202_v1  ;;  %v22_v10 = vld [vmem:[%s283_s1 + $0x30] sm:$0xff]  ;;  %v21_v11 = vld [vmem:[%s283_s1 + $0x28] sm:$0xff]  ;;  %v20_v12 = vld [vmem:[%s283_s1 + $0x20] sm:$0xff]  ;;  %p185_p1 = scmp.lt.s32.totalorder %s117_s22, %s117_s22 }
   0xa   :  { %151 = vmatpush3.msra.mxu0 %v27_v5  ;;  %v19_v13 = vld [vmem:[%s283_s1 + $0x18] sm:$0xff]  ;;  %v18_v14 = vld [vmem:[%s283_s1 + $0x10] sm:$0xff]  ;;  %v17_v15 = vld [vmem:[%s283_s1 + $0x8] sm:$0xff] }
   0xb   :  { %152 = vmatprep.subr.mxu0 %v202_v1  ;;  %v16_v16 = vld [vmem:[%s283_s1] sm:$0xff]  ;;  %s180_s1 = scalar_lea.vmem %s117_s22, 32 }
   0xc   :  { %153 = vmatpush3.msra.mxu0 %v26_v6  ;;  %v15_v17 = vld [vmem:[%s282_s0] sm:$0x3]  ;;  %p181_p0 = scmp.ne.s32.totalorder %s117_s22, %s180_s1  ;;  %p186_p2 = scmp.lt.s32.totalorder %s180_s1, %s180_s1 }
   0xd   :  { %154 = vmatprep.subr.mxu0 %v202_v1  ;;  %v124_v18 = vld [vmem:[%s284_s2] ss:$0 sm:$0xff] }
   0xe   :  { %155 = vmatpush3.msra.mxu0 %v25_v7  ;;  %p187_p3 = por %p186_p2, %p185_p1 }
   0xf   :  { %156 = vmatprep.subr.mxu0 %v202_v1 }
  0x10   :  { %157 = vmatpush3.msra.mxu0 %v24_v8  ;;  %p188_p4 = pnand %p187_p3, %p181_p0 }
  0x11   :  { %158 = vmatprep.subr.mxu0 %v202_v1 }
  0x12   :  { %159 = vmatpush3.msra.mxu0 %v23_v9 }
  0x13   :  { %160 = vmatprep.subr.mxu0 %v202_v1 }
  0x14   :  { %161 = vmatpush3.msra.mxu0 %v22_v10 }
  0x15   :  { %162 = vmatprep.subr.mxu0 %v202_v1 }
  0x16   :  { %163 = vmatpush3.msra.mxu0 %v21_v11 }
  0x17   :  { %164 = vmatprep.subr.mxu0 %v202_v1 }
  0x18   :  { %165 = vmatpush3.msra.mxu0 %v20_v12 }
  0x19   :  { %166 = vmatprep.subr.mxu0 %v202_v1 }
  0x1a   :  { %167 = vmatpush3.msra.mxu0 %v19_v13 }
  0x1b   :  { %168 = vmatprep.subr.mxu0 %v202_v1 }
  0x1c   :  { %169 = vmatpush3.msra.mxu0 %v18_v14 }
  0x1d   :  { %170 = vmatprep.subr.mxu0 %v202_v1 }
  0x1e   :  { %171 = vmatpush3.msra.mxu0 %v17_v15 }
  0x1f   :  { %172 = vmatprep.subr.mxu0 %v202_v1 }
  0x20   :  { %173 = vmatpush3.msra.mxu0 %v16_v16 }
  0x21   :  { %175 = vmatmul.mubr.f32.vlgmr.msra.gmra.mxu0 %v15_v17 }
  0xe1   :  { %v105_v19 = vpop.f32.mrf.mxu0 }
  0xe2   :  { %v106_v20 = vadd.f32 %v124_v18, %v105_v19 }
  0xe3   :  { %v176_v21 = vpop.f32.mrf.mxu0 }
  0xe4   :  { %109 = vst [vmem:[#allocation2] sm:$0x3] %v106_v20 }
  0xe5   :  { %191 = shalt.err (!%p188_p4)
}
  0xe6   :  { %119 = dma.vmem_to_hbm [thread:$0]  %s117_s22, 32, %s285_s3, [#allocation3]  }
  0xe7   :  { %200 = dma.done.wait [#allocation3], 32  }
  0xe8   :  { %201 = vsyncadd [#allocation3], 4294967264 }
  0xe9   :  { %123 = vsyncpa [#allocation3], 1 }

</bundles_post_ra>
